<compile_context>
chip_gen: v6e
topology: v6e:2x2x1
jax: 0.10.0
libtpu: 0.0.40
codegen_flags: <defaults>
</compile_context>

<pallas_src>
import jax
import jax.numpy as jnp
from jax.experimental import pallas as pl
from jax.experimental.pallas import tpu as pltpu


SUBLANE = 8  # f32 sublane tile height


# ------------------------------ fused kernel ------------------------------- #

def _make_fused_kernel(num_layers, T, BPAD, H, Din):
    G = 4 * H  # compact gate width; for H=32 exactly one 128-lane vreg row

    def kernel(*refs):
        # refs = [x, (w_ih, w_hh, b) * L, fc_w, fc_b] + [out] + [xw, hseq scratch]
        x_ref = refs[0]
        lw = refs[1:1 + 3 * num_layers]
        fcw_ref = refs[1 + 3 * num_layers]        # (1, H)
        fcb_ref = refs[2 + 3 * num_layers]        # (1, 1)
        out_ref = refs[3 + 3 * num_layers]        # (L, BPAD, 1)
        xw_ref = refs[4 + 3 * num_layers]         # (T*BPAD, G)  VMEM scratch
        hseq_ref = refs[5 + 3 * num_layers]       # (T*BPAD, H)  VMEM scratch

        fcw = fcw_ref[...]                        # loaded once
        fcb = fcb_ref[...]

        # Layer-0 input projection, hoisted out of the recurrence, bias folded in.
        x = x_ref[...]                            # (T*BPAD, Din)
        wih0 = lw[0][...]                         # (Din, G)
        b0 = lw[2][...]                           # (1, G)
        if Din == 1:
            # degenerate K=1 matmul -> VPU broadcast multiply
            xw_ref[...] = x * wih0 + b0
        else:
            xw_ref[...] = jnp.dot(x, wih0, preferred_element_type=jnp.float32) + b0

        for l in range(num_layers):
            whh = lw[3 * l + 1][...]              # (H, G) hoisted: one load per layer
            h = jnp.zeros((BPAD, H), jnp.float32)
            c = jnp.zeros((BPAD, H), jnp.float32)
            for t in range(T):                    # fully unrolled (T static, small)
                # statically sublane-aligned slice of the precomputed projection
                gates = xw_ref[t * BPAD:(t + 1) * BPAD, :] + jnp.dot(
                    h, whh, preferred_element_type=jnp.float32)      # (BPAD, G)
                # one full-vreg sigmoid + one full-vreg tanh, then 32-lane selects
                sig = jax.nn.sigmoid(gates)
                tah = jnp.tanh(gates)
                i = sig[:, 0 * H:1 * H]
                f = sig[:, 1 * H:2 * H]
                g = tah[:, 2 * H:3 * H]
                o = sig[:, 3 * H:4 * H]
                c = f * c + i * g
                h = o * jnp.tanh(c)
                if l + 1 < num_layers:
                    # hidden sequence stays in VMEM scratch only (never HBM)
                    hseq_ref[t * BPAD:(t + 1) * BPAD, :] = h

            # FC epilogue on this layer's final cell state (== PyTorch hn[-1] -> c_n).
            out_ref[l] = jnp.sum(c * fcw, axis=-1, keepdims=True) + fcb

            if l + 1 < num_layers:
                # Hoisted input projection for the next layer:
                # one (T*BPAD, H) x (H, G) matmul with the bias folded in.
                wih = lw[3 * (l + 1)][...]        # (H, G)
                b = lw[3 * (l + 1) + 2][...]      # (1, G)
                xw_ref[...] = jnp.dot(hseq_ref[...], wih,
                                      preferred_element_type=jnp.float32) + b

    return kernel


# -------------------------------- wrapper ----------------------------------- #

def lstm_model_forward(x_btd, packed):
    """x_btd: (B, T, input_size) -> (num_layers, B, 1)  (== fc(c_n), see note)."""
    B, T, Din = x_btd.shape
    layers = packed['layers']
    L = len(layers)
    H = packed['fc_w'].shape[1]
    G = 4 * H
    BPAD = ((B + SUBLANE - 1) // SUBLANE) * SUBLANE   # pad batch to sublane multiple

    # time-major, batch padded to BPAD sublanes, flattened to (T*BPAD, Din)
    x_tb = jnp.transpose(x_btd, (1, 0, 2)).astype(jnp.float32)        # (T, B, Din)
    x_pad = jnp.zeros((T, BPAD, Din), jnp.float32).at[:, :B, :].set(x_tb)
    x_flat = x_pad.reshape(T * BPAD, Din)

    kernel = _make_fused_kernel(L, T, BPAD, H, Din)

    args = [x_flat]
    for (wih, whh, b) in layers:
        args += [wih, whh, b]
    args += [packed['fc_w'], packed['fc_b']]

    vmem_spec = pl.BlockSpec(memory_space=pltpu.MemorySpace.VMEM)
    out = pl.pallas_call(
        kernel,
        # grid=() : single invocation, whole arrays resident in VMEM
        # (no pipelining / double-buffering bookkeeping).
        in_specs=[vmem_spec] * len(args),
        out_specs=vmem_spec,
        out_shape=jax.ShapeDtypeStruct((L, BPAD, 1), jnp.float32),
        scratch_shapes=[pltpu.VMEM((T * BPAD, G), jnp.float32),   # hoisted input proj
                        pltpu.VMEM((T * BPAD, H), jnp.float32)],  # inter-layer hidden seq
    )(*args)
    return out[:, :B, :]


# ------------------------- params, packing, reference ----------------------- #

def init_params(key, input_size, hidden_size, num_layers):
    """PyTorch-layout parameters (weight_ih: (4H, Din), weight_hh: (4H, H))."""
    k = 1.0 / float(hidden_size) ** 0.5
    params = {'lstm': []}
    din = input_size
    for _ in range(num_layers):
        key, k1, k2, k3, k4 = jax.random.split(key, 5)
        w_ih = jax.random.uniform(k1, (4 * hidden_size, din), jnp.float32, -k, k)
        w_hh = jax.random.uniform(k2, (4 * hidden_size, hidden_size), jnp.float32, -k, k)
        b_ih = jax.random.uniform(k3, (4 * hidden_size,), jnp.float32, -k, k)
        b_hh = jax.random.uniform(k4, (4 * hidden_size,), jnp.float32, -k, k)
        params['lstm'].append((w_ih, w_hh, b_ih, b_hh))
        din = hidden_size
    key, k1, k2 = jax.random.split(key, 3)
    params['fc_w'] = jax.random.uniform(k1, (1, hidden_size), jnp.float32, -k, k)
    params['fc_b'] = jax.random.uniform(k2, (1,), jnp.float32, -k, k)
    return params


def pack_params(params):
    """One-time weight prep: transpose to (K, 4H) and fuse the two biases.

    Compact gate layout: gates live in G = 4H lanes (for H=32 exactly one 128-lane
    vreg row; gate g occupies lanes [g*H, (g+1)*H)).  K dims (Din / H) need no row
    padding here since H=32 is already a sublane multiple.
    """
    layers = []
    for (w_ih, w_hh, b_ih, b_hh) in params['lstm']:
        w_ih_t = jnp.transpose(w_ih).astype(jnp.float32)   # (Din or H, 4H)
        w_hh_t = jnp.transpose(w_hh).astype(jnp.float32)   # (H, 4H)
        b = (b_ih + b_hh)[None, :].astype(jnp.float32)     # (1, 4H)
        layers.append((w_ih_t, w_hh_t, b))
    return {'layers': layers,
            'fc_w': params['fc_w'].astype(jnp.float32),             # (1, H)
            'fc_b': params['fc_b'].reshape(1, 1).astype(jnp.float32)}


def reference_forward(x_btd, params):
    B, T, _ = x_btd.shape
    H = params['lstm'][0][1].shape[1]
    inp = jnp.transpose(x_btd, (1, 0, 2)).astype(jnp.float32)
    c_finals = []
    for (w_ih, w_hh, b_ih, b_hh) in params['lstm']:
        h = jnp.zeros((B, H), jnp.float32)
        c = jnp.zeros((B, H), jnp.float32)
        hs = []
        for t in range(T):
            gates = inp[t] @ w_ih.T + b_ih + h @ w_hh.T + b_hh
            i = jax.nn.sigmoid(gates[:, :H])
            f = jax.nn.sigmoid(gates[:, H:2 * H])
            g = jnp.tanh(gates[:, 2 * H:3 * H])
            o = jax.nn.sigmoid(gates[:, 3 * H:4 * H])
            c = f * c + i * g
            h = o * jnp.tanh(c)
            hs.append(h)
        inp = jnp.stack(hs, axis=0)
        c_finals.append(c)
    c_n = jnp.stack(c_finals, axis=0)                         # (L, B, H)
    return jnp.einsum('lbh,oh->lbo', c_n, params['fc_w']) + params['fc_b']


# ---------------------------------- main ------------------------------------ #

if __name__ == "__main__":
    input_size, hidden_size, num_layers = 1, 32, 2
    B, T = 2, 8

    key = jax.random.PRNGKey(0)
    key, xkey, pkey = jax.random.split(key, 3)
    x = jax.random.normal(xkey, (B, T, input_size), dtype=jnp.float32)
    params = init_params(pkey, input_size, hidden_size, num_layers)
    packed = pack_params(params)   # one-time transpose / bias-fuse

    fwd = jax.jit(lstm_model_forward)
    out = jax.block_until_ready(fwd(x, packed))

    ref = jax.block_until_ready(reference_forward(x, params))
    assert out.shape == (num_layers, B, 1), out.shape
    assert jnp.allclose(out, ref, atol=2e-4, rtol=2e-4), (out, ref)

    print("KERNEL_OK")
</pallas_src>

<mosaic_0001>
module attributes {stable_mosaic.version = 11 : i64} {
  func.func @kernel(%arg0: memref<64x1xf32, #tpu.memory_space<vmem>>, %arg1: memref<1x128xf32, #tpu.memory_space<vmem>>, %arg2: memref<32x128xf32, #tpu.memory_space<vmem>>, %arg3: memref<1x128xf32, #tpu.memory_space<vmem>>, %arg4: memref<32x128xf32, #tpu.memory_space<vmem>>, %arg5: memref<32x128xf32, #tpu.memory_space<vmem>>, %arg6: memref<1x128xf32, #tpu.memory_space<vmem>>, %arg7: memref<1x32xf32, #tpu.memory_space<vmem>>, %arg8: memref<1x1xf32, #tpu.memory_space<vmem>>, %arg9: memref<2x8x1xf32, #tpu.memory_space<vmem>>, %arg10: memref<64x128xf32, #tpu.memory_space<vmem>>, %arg11: memref<64x32xf32, #tpu.memory_space<vmem>>) attributes {dimension_semantics = [], scalar_prefetch = 0 : i64, scratch_operands = 2 : i64, tpu.core_type = #tpu.core_type<tc>} {
    %c0 = arith.constant 0 : index
    %c0_0 = arith.constant 0 : index
    %0 = vector.load %arg7[%c0, %c0_0] : memref<1x32xf32, #tpu.memory_space<vmem>>, vector<1x32xf32>
    %c0_1 = arith.constant 0 : index
    %c0_2 = arith.constant 0 : index
    %1 = vector.load %arg8[%c0_1, %c0_2] : memref<1x1xf32, #tpu.memory_space<vmem>>, vector<1x1xf32>
    %c0_3 = arith.constant 0 : index
    %c0_4 = arith.constant 0 : index
    %2 = vector.load %arg0[%c0_3, %c0_4] : memref<64x1xf32, #tpu.memory_space<vmem>>, vector<64x1xf32>
    %c0_5 = arith.constant 0 : index
    %c0_6 = arith.constant 0 : index
    %3 = vector.load %arg1[%c0_5, %c0_6] : memref<1x128xf32, #tpu.memory_space<vmem>>, vector<1x128xf32>
    %c0_7 = arith.constant 0 : index
    %c0_8 = arith.constant 0 : index
    %4 = vector.load %arg3[%c0_7, %c0_8] : memref<1x128xf32, #tpu.memory_space<vmem>>, vector<1x128xf32>
    %5 = vector.broadcast %2 : vector<64x1xf32> to vector<64x128xf32>
    %6 = vector.broadcast %3 : vector<1x128xf32> to vector<64x128xf32>
    %7 = arith.mulf %5, %6 : vector<64x128xf32>
    %8 = vector.broadcast %4 : vector<1x128xf32> to vector<64x128xf32>
    %9 = arith.addf %7, %8 : vector<64x128xf32>
    %c0_9 = arith.constant 0 : index
    %c0_10 = arith.constant 0 : index
    %10 = vector.load %arg10[%c0_9, %c0_10] : memref<64x128xf32, #tpu.memory_space<vmem>>, vector<64x128xf32>
    tpu.vector_store %arg10[%c0_9, %c0_10], %9 {strides = array<i32>} : memref<64x128xf32, #tpu.memory_space<vmem>>, vector<64x128xf32>,
    %c0_11 = arith.constant 0 : index
    %c0_12 = arith.constant 0 : index
    %11 = vector.load %arg2[%c0_11, %c0_12] : memref<32x128xf32, #tpu.memory_space<vmem>>, vector<32x128xf32>
    %cst = arith.constant 0.000000e+00 : f32
    %12 = vector.broadcast %cst : f32 to vector<8x32xf32>
    %cst_13 = arith.constant 0.000000e+00 : f32
    %13 = vector.broadcast %cst_13 : f32 to vector<8x32xf32>
    %c0_14 = arith.constant 0 : index
    %c0_15 = arith.constant 0 : index
    %14 = vector.load %arg10[%c0_14, %c0_15] : memref<64x128xf32, #tpu.memory_space<vmem>>, vector<8x128xf32>
    %cst_16 = arith.constant dense<0.000000e+00> : vector<8x128xf32>
    %15 = tpu.matmul %12, %11, %cst_16 {dimension_numbers = #tpu.dot_dimension_numbers<[1], [0], [0], [1], [0, 0, 1, 1], [], []>} : vector<8x32xf32>, vector<32x128xf32>, vector<8x128xf32> -> vector<8x128xf32>
    %16 = arith.addf %14, %15 : vector<8x128xf32>
    %17 = arith.negf %16 : vector<8x128xf32>
    %18 = math.exp %17 : vector<8x128xf32>
    %cst_17 = arith.constant 1.000000e+00 : f32
    %19 = vector.broadcast %cst_17 : f32 to vector<8x128xf32>
    %20 = arith.addf %19, %18 : vector<8x128xf32>
    %21 = arith.divf %19, %20 : vector<8x128xf32>
    %22 = math.tanh %16 : vector<8x128xf32>
    %23 = vector.extract_strided_slice %21 {offsets = [0, 0], sizes = [8, 32], strides = [1, 1]} : vector<8x128xf32> to vector<8x32xf32>
    %24 = vector.extract_strided_slice %21 {offsets = [0, 32], sizes = [8, 32], strides = [1, 1]} : vector<8x128xf32> to vector<8x32xf32>
    %25 = vector.extract_strided_slice %22 {offsets = [0, 64], sizes = [8, 32], strides = [1, 1]} : vector<8x128xf32> to vector<8x32xf32>
    %26 = vector.extract_strided_slice %21 {offsets = [0, 96], sizes = [8, 32], strides = [1, 1]} : vector<8x128xf32> to vector<8x32xf32>
    %27 = arith.mulf %24, %13 : vector<8x32xf32>
    %28 = arith.mulf %23, %25 : vector<8x32xf32>
    %29 = arith.addf %27, %28 : vector<8x32xf32>
    %30 = math.tanh %29 : vector<8x32xf32>
    %31 = arith.mulf %26, %30 : vector<8x32xf32>
    %c0_18 = arith.constant 0 : index
    %c0_19 = arith.constant 0 : index
    %32 = vector.load %arg11[%c0_18, %c0_19] : memref<64x32xf32, #tpu.memory_space<vmem>>, vector<8x32xf32>
    tpu.vector_store %arg11[%c0_18, %c0_19], %31 {strides = array<i32>} : memref<64x32xf32, #tpu.memory_space<vmem>>, vector<8x32xf32>,
    %c8 = arith.constant 8 : index
    %c0_20 = arith.constant 0 : index
    %33 = vector.load %arg10[%c8, %c0_20] : memref<64x128xf32, #tpu.memory_space<vmem>>, vector<8x128xf32>
    %cst_21 = arith.constant dense<0.000000e+00> : vector<8x128xf32>
    %34 = tpu.matmul %31, %11, %cst_21 {dimension_numbers = #tpu.dot_dimension_numbers<[1], [0], [0], [1], [0, 0, 1, 1], [], []>} : vector<8x32xf32>, vector<32x128xf32>, vector<8x128xf32> -> vector<8x128xf32>
    %35 = arith.addf %33, %34 : vector<8x128xf32>
    %36 = arith.negf %35 : vector<8x128xf32>
    %37 = math.exp %36 : vector<8x128xf32>
    %cst_22 = arith.constant 1.000000e+00 : f32
    %38 = vector.broadcast %cst_22 : f32 to vector<8x128xf32>
    %39 = arith.addf %38, %37 : vector<8x128xf32>
    %40 = arith.divf %38, %39 : vector<8x128xf32>
    %41 = math.tanh %35 : vector<8x128xf32>
    %42 = vector.extract_strided_slice %40 {offsets = [0, 0], sizes = [8, 32], strides = [1, 1]} : vector<8x128xf32> to vector<8x32xf32>
    %43 = vector.extract_strided_slice %40 {offsets = [0, 32], sizes = [8, 32], strides = [1, 1]} : vector<8x128xf32> to vector<8x32xf32>
    %44 = vector.extract_strided_slice %41 {offsets = [0, 64], sizes = [8, 32], strides = [1, 1]} : vector<8x128xf32> to vector<8x32xf32>
    %45 = vector.extract_strided_slice %40 {offsets = [0, 96], sizes = [8, 32], strides = [1, 1]} : vector<8x128xf32> to vector<8x32xf32>
    %46 = arith.mulf %43, %29 : vector<8x32xf32>
    %47 = arith.mulf %42, %44 : vector<8x32xf32>
    %48 = arith.addf %46, %47 : vector<8x32xf32>
    %49 = math.tanh %48 : vector<8x32xf32>
    %50 = arith.mulf %45, %49 : vector<8x32xf32>
    %c8_23 = arith.constant 8 : index
    %c0_24 = arith.constant 0 : index
    %51 = vector.load %arg11[%c8_23, %c0_24] : memref<64x32xf32, #tpu.memory_space<vmem>>, vector<8x32xf32>
    tpu.vector_store %arg11[%c8_23, %c0_24], %50 {strides = array<i32>} : memref<64x32xf32, #tpu.memory_space<vmem>>, vector<8x32xf32>,
    %c16 = arith.constant 16 : index
    %c0_25 = arith.constant 0 : index
    %52 = vector.load %arg10[%c16, %c0_25] : memref<64x128xf32, #tpu.memory_space<vmem>>, vector<8x128xf32>
    %cst_26 = arith.constant dense<0.000000e+00> : vector<8x128xf32>
    %53 = tpu.matmul %50, %11, %cst_26 {dimension_numbers = #tpu.dot_dimension_numbers<[1], [0], [0], [1], [0, 0, 1, 1], [], []>} : vector<8x32xf32>, vector<32x128xf32>, vector<8x128xf32> -> vector<8x128xf32>
    %54 = arith.addf %52, %53 : vector<8x128xf32>
    %55 = arith.negf %54 : vector<8x128xf32>
    %56 = math.exp %55 : vector<8x128xf32>
    %cst_27 = arith.constant 1.000000e+00 : f32
    %57 = vector.broadcast %cst_27 : f32 to vector<8x128xf32>
    %58 = arith.addf %57, %56 : vector<8x128xf32>
    %59 = arith.divf %57, %58 : vector<8x128xf32>
    %60 = math.tanh %54 : vector<8x128xf32>
    %61 = vector.extract_strided_slice %59 {offsets = [0, 0], sizes = [8, 32], strides = [1, 1]} : vector<8x128xf32> to vector<8x32xf32>
    %62 = vector.extract_strided_slice %59 {offsets = [0, 32], sizes = [8, 32], strides = [1, 1]} : vector<8x128xf32> to vector<8x32xf32>
    %63 = vector.extract_strided_slice %60 {offsets = [0, 64], sizes = [8, 32], strides = [1, 1]} : vector<8x128xf32> to vector<8x32xf32>
    %64 = vector.extract_strided_slice %59 {offsets = [0, 96], sizes = [8, 32], strides = [1, 1]} : vector<8x128xf32> to vector<8x32xf32>
    %65 = arith.mulf %62, %48 : vector<8x32xf32>
    %66 = arith.mulf %61, %63 : vector<8x32xf32>
    %67 = arith.addf %65, %66 : vector<8x32xf32>
    %68 = math.tanh %67 : vector<8x32xf32>
    %69 = arith.mulf %64, %68 : vector<8x32xf32>
    %c16_28 = arith.constant 16 : index
    %c0_29 = arith.constant 0 : index
    %70 = vector.load %arg11[%c16_28, %c0_29] : memref<64x32xf32, #tpu.memory_space<vmem>>, vector<8x32xf32>
    tpu.vector_store %arg11[%c16_28, %c0_29], %69 {strides = array<i32>} : memref<64x32xf32, #tpu.memory_space<vmem>>, vector<8x32xf32>,
    %c24 = arith.constant 24 : index
    %c0_30 = arith.constant 0 : index
    %71 = vector.load %arg10[%c24, %c0_30] : memref<64x128xf32, #tpu.memory_space<vmem>>, vector<8x128xf32>
    %cst_31 = arith.constant dense<0.000000e+00> : vector<8x128xf32>
    %72 = tpu.matmul %69, %11, %cst_31 {dimension_numbers = #tpu.dot_dimension_numbers<[1], [0], [0], [1], [0, 0, 1, 1], [], []>} : vector<8x32xf32>, vector<32x128xf32>, vector<8x128xf32> -> vector<8x128xf32>
    %73 = arith.addf %71, %72 : vector<8x128xf32>
    %74 = arith.negf %73 : vector<8x128xf32>
    %75 = math.exp %74 : vector<8x128xf32>
    %cst_32 = arith.constant 1.000000e+00 : f32
    %76 = vector.broadcast %cst_32 : f32 to vector<8x128xf32>
    %77 = arith.addf %76, %75 : vector<8x128xf32>
    %78 = arith.divf %76, %77 : vector<8x128xf32>
    %79 = math.tanh %73 : vector<8x128xf32>
    %80 = vector.extract_strided_slice %78 {offsets = [0, 0], sizes = [8, 32], strides = [1, 1]} : vector<8x128xf32> to vector<8x32xf32>
    %81 = vector.extract_strided_slice %78 {offsets = [0, 32], sizes = [8, 32], strides = [1, 1]} : vector<8x128xf32> to vector<8x32xf32>
    %82 = vector.extract_strided_slice %79 {offsets = [0, 64], sizes = [8, 32], strides = [1, 1]} : vector<8x128xf32> to vector<8x32xf32>
    %83 = vector.extract_strided_slice %78 {offsets = [0, 96], sizes = [8, 32], strides = [1, 1]} : vector<8x128xf32> to vector<8x32xf32>
    %84 = arith.mulf %81, %67 : vector<8x32xf32>
    %85 = arith.mulf %80, %82 : vector<8x32xf32>
    %86 = arith.addf %84, %85 : vector<8x32xf32>
    %87 = math.tanh %86 : vector<8x32xf32>
    %88 = arith.mulf %83, %87 : vector<8x32xf32>
    %c24_33 = arith.constant 24 : index
    %c0_34 = arith.constant 0 : index
    %89 = vector.load %arg11[%c24_33, %c0_34] : memref<64x32xf32, #tpu.memory_space<vmem>>, vector<8x32xf32>
    tpu.vector_store %arg11[%c24_33, %c0_34], %88 {strides = array<i32>} : memref<64x32xf32, #tpu.memory_space<vmem>>, vector<8x32xf32>,
    %c32 = arith.constant 32 : index
    %c0_35 = arith.constant 0 : index
    %90 = vector.load %arg10[%c32, %c0_35] : memref<64x128xf32, #tpu.memory_space<vmem>>, vector<8x128xf32>
    %cst_36 = arith.constant dense<0.000000e+00> : vector<8x128xf32>
    %91 = tpu.matmul %88, %11, %cst_36 {dimension_numbers = #tpu.dot_dimension_numbers<[1], [0], [0], [1], [0, 0, 1, 1], [], []>} : vector<8x32xf32>, vector<32x128xf32>, vector<8x128xf32> -> vector<8x128xf32>
    %92 = arith.addf %90, %91 : vector<8x128xf32>
    %93 = arith.negf %92 : vector<8x128xf32>
    %94 = math.exp %93 : vector<8x128xf32>
    %cst_37 = arith.constant 1.000000e+00 : f32
    %95 = vector.broadcast %cst_37 : f32 to vector<8x128xf32>
    %96 = arith.addf %95, %94 : vector<8x128xf32>
    %97 = arith.divf %95, %96 : vector<8x128xf32>
    %98 = math.tanh %92 : vector<8x128xf32>
    %99 = vector.extract_strided_slice %97 {offsets = [0, 0], sizes = [8, 32], strides = [1, 1]} : vector<8x128xf32> to vector<8x32xf32>
    %100 = vector.extract_strided_slice %97 {offsets = [0, 32], sizes = [8, 32], strides = [1, 1]} : vector<8x128xf32> to vector<8x32xf32>
    %101 = vector.extract_strided_slice %98 {offsets = [0, 64], sizes = [8, 32], strides = [1, 1]} : vector<8x128xf32> to vector<8x32xf32>
    %102 = vector.extract_strided_slice %97 {offsets = [0, 96], sizes = [8, 32], strides = [1, 1]} : vector<8x128xf32> to vector<8x32xf32>
    %103 = arith.mulf %100, %86 : vector<8x32xf32>
    %104 = arith.mulf %99, %101 : vector<8x32xf32>
    %105 = arith.addf %103, %104 : vector<8x32xf32>
    %106 = math.tanh %105 : vector<8x32xf32>
    %107 = arith.mulf %102, %106 : vector<8x32xf32>
    %c32_38 = arith.constant 32 : index
    %c0_39 = arith.constant 0 : index
    %108 = vector.load %arg11[%c32_38, %c0_39] : memref<64x32xf32, #tpu.memory_space<vmem>>, vector<8x32xf32>
    tpu.vector_store %arg11[%c32_38, %c0_39], %107 {strides = array<i32>} : memref<64x32xf32, #tpu.memory_space<vmem>>, vector<8x32xf32>,
    %c40 = arith.constant 40 : index
    %c0_40 = arith.constant 0 : index
    %109 = vector.load %arg10[%c40, %c0_40] : memref<64x128xf32, #tpu.memory_space<vmem>>, vector<8x128xf32>
    %cst_41 = arith.constant dense<0.000000e+00> : vector<8x128xf32>
    %110 = tpu.matmul %107, %11, %cst_41 {dimension_numbers = #tpu.dot_dimension_numbers<[1], [0], [0], [1], [0, 0, 1, 1], [], []>} : vector<8x32xf32>, vector<32x128xf32>, vector<8x128xf32> -> vector<8x128xf32>
    %111 = arith.addf %109, %110 : vector<8x128xf32>
    %112 = arith.negf %111 : vector<8x128xf32>
    %113 = math.exp %112 : vector<8x128xf32>
    %cst_42 = arith.constant 1.000000e+00 : f32
    %114 = vector.broadcast %cst_42 : f32 to vector<8x128xf32>
    %115 = arith.addf %114, %113 : vector<8x128xf32>
    %116 = arith.divf %114, %115 : vector<8x128xf32>
    %117 = math.tanh %111 : vector<8x128xf32>
    %118 = vector.extract_strided_slice %116 {offsets = [0, 0], sizes = [8, 32], strides = [1, 1]} : vector<8x128xf32> to vector<8x32xf32>
    %119 = vector.extract_strided_slice %116 {offsets = [0, 32], sizes = [8, 32], strides = [1, 1]} : vector<8x128xf32> to vector<8x32xf32>
    %120 = vector.extract_strided_slice %117 {offsets = [0, 64], sizes = [8, 32], strides = [1, 1]} : vector<8x128xf32> to vector<8x32xf32>
    %121 = vector.extract_strided_slice %116 {offsets = [0, 96], sizes = [8, 32], strides = [1, 1]} : vector<8x128xf32> to vector<8x32xf32>
    %122 = arith.mulf %119, %105 : vector<8x32xf32>
    %123 = arith.mulf %118, %120 : vector<8x32xf32>
    %124 = arith.addf %122, %123 : vector<8x32xf32>
    %125 = math.tanh %124 : vector<8x32xf32>
    %126 = arith.mulf %121, %125 : vector<8x32xf32>
    %c40_43 = arith.constant 40 : index
    %c0_44 = arith.constant 0 : index
    %127 = vector.load %arg11[%c40_43, %c0_44] : memref<64x32xf32, #tpu.memory_space<vmem>>, vector<8x32xf32>
    tpu.vector_store %arg11[%c40_43, %c0_44], %126 {strides = array<i32>} : memref<64x32xf32, #tpu.memory_space<vmem>>, vector<8x32xf32>,
    %c48 = arith.constant 48 : index
    %c0_45 = arith.constant 0 : index
    %128 = vector.load %arg10[%c48, %c0_45] : memref<64x128xf32, #tpu.memory_space<vmem>>, vector<8x128xf32>
    %cst_46 = arith.constant dense<0.000000e+00> : vector<8x128xf32>
    %129 = tpu.matmul %126, %11, %cst_46 {dimension_numbers = #tpu.dot_dimension_numbers<[1], [0], [0], [1], [0, 0, 1, 1], [], []>} : vector<8x32xf32>, vector<32x128xf32>, vector<8x128xf32> -> vector<8x128xf32>
    %130 = arith.addf %128, %129 : vector<8x128xf32>
    %131 = arith.negf %130 : vector<8x128xf32>
    %132 = math.exp %131 : vector<8x128xf32>
    %cst_47 = arith.constant 1.000000e+00 : f32
    %133 = vector.broadcast %cst_47 : f32 to vector<8x128xf32>
    %134 = arith.addf %133, %132 : vector<8x128xf32>
    %135 = arith.divf %133, %134 : vector<8x128xf32>
    %136 = math.tanh %130 : vector<8x128xf32>
    %137 = vector.extract_strided_slice %135 {offsets = [0, 0], sizes = [8, 32], strides = [1, 1]} : vector<8x128xf32> to vector<8x32xf32>
    %138 = vector.extract_strided_slice %135 {offsets = [0, 32], sizes = [8, 32], strides = [1, 1]} : vector<8x128xf32> to vector<8x32xf32>
    %139 = vector.extract_strided_slice %136 {offsets = [0, 64], sizes = [8, 32], strides = [1, 1]} : vector<8x128xf32> to vector<8x32xf32>
    %140 = vector.extract_strided_slice %135 {offsets = [0, 96], sizes = [8, 32], strides = [1, 1]} : vector<8x128xf32> to vector<8x32xf32>
    %141 = arith.mulf %138, %124 : vector<8x32xf32>
    %142 = arith.mulf %137, %139 : vector<8x32xf32>
    %143 = arith.addf %141, %142 : vector<8x32xf32>
    %144 = math.tanh %143 : vector<8x32xf32>
    %145 = arith.mulf %140, %144 : vector<8x32xf32>
    %c48_48 = arith.constant 48 : index
    %c0_49 = arith.constant 0 : index
    %146 = vector.load %arg11[%c48_48, %c0_49] : memref<64x32xf32, #tpu.memory_space<vmem>>, vector<8x32xf32>
    tpu.vector_store %arg11[%c48_48, %c0_49], %145 {strides = array<i32>} : memref<64x32xf32, #tpu.memory_space<vmem>>, vector<8x32xf32>,
    %c56 = arith.constant 56 : index
    %c0_50 = arith.constant 0 : index
    %147 = vector.load %arg10[%c56, %c0_50] : memref<64x128xf32, #tpu.memory_space<vmem>>, vector<8x128xf32>
    %cst_51 = arith.constant dense<0.000000e+00> : vector<8x128xf32>
    %148 = tpu.matmul %145, %11, %cst_51 {dimension_numbers = #tpu.dot_dimension_numbers<[1], [0], [0], [1], [0, 0, 1, 1], [], []>} : vector<8x32xf32>, vector<32x128xf32>, vector<8x128xf32> -> vector<8x128xf32>
    %149 = arith.addf %147, %148 : vector<8x128xf32>
    %150 = arith.negf %149 : vector<8x128xf32>
    %151 = math.exp %150 : vector<8x128xf32>
    %cst_52 = arith.constant 1.000000e+00 : f32
    %152 = vector.broadcast %cst_52 : f32 to vector<8x128xf32>
    %153 = arith.addf %152, %151 : vector<8x128xf32>
    %154 = arith.divf %152, %153 : vector<8x128xf32>
    %155 = math.tanh %149 : vector<8x128xf32>
    %156 = vector.extract_strided_slice %154 {offsets = [0, 0], sizes = [8, 32], strides = [1, 1]} : vector<8x128xf32> to vector<8x32xf32>
    %157 = vector.extract_strided_slice %154 {offsets = [0, 32], sizes = [8, 32], strides = [1, 1]} : vector<8x128xf32> to vector<8x32xf32>
    %158 = vector.extract_strided_slice %155 {offsets = [0, 64], sizes = [8, 32], strides = [1, 1]} : vector<8x128xf32> to vector<8x32xf32>
    %159 = vector.extract_strided_slice %154 {offsets = [0, 96], sizes = [8, 32], strides = [1, 1]} : vector<8x128xf32> to vector<8x32xf32>
    %160 = arith.mulf %157, %143 : vector<8x32xf32>
    %161 = arith.mulf %156, %158 : vector<8x32xf32>
    %162 = arith.addf %160, %161 : vector<8x32xf32>
    %163 = math.tanh %162 : vector<8x32xf32>
    %164 = arith.mulf %159, %163 : vector<8x32xf32>
    %c56_53 = arith.constant 56 : index
    %c0_54 = arith.constant 0 : index
    %165 = vector.load %arg11[%c56_53, %c0_54] : memref<64x32xf32, #tpu.memory_space<vmem>>, vector<8x32xf32>
    tpu.vector_store %arg11[%c56_53, %c0_54], %164 {strides = array<i32>} : memref<64x32xf32, #tpu.memory_space<vmem>>, vector<8x32xf32>,
    %166 = vector.broadcast %0 : vector<1x32xf32> to vector<8x32xf32>
    %167 = arith.mulf %162, %166 : vector<8x32xf32>
    %cst_55 = arith.constant dense<0.000000e+00> : vector<8xf32>
    %168 = vector.multi_reduction <add>, %167, %cst_55 [1] : vector<8x32xf32> to vector<8xf32>
    %169 = vector.shape_cast %168 : vector<8xf32> to vector<8x1xf32>
    %170 = vector.broadcast %1 : vector<1x1xf32> to vector<8x1xf32>
    %171 = arith.addf %169, %170 : vector<8x1xf32>
    %c0_56 = arith.constant 0 : index
    %c0_57 = arith.constant 0 : index
    %c0_58 = arith.constant 0 : index
    %172 = vector.load %arg9[%c0_56, %c0_57, %c0_58] : memref<2x8x1xf32, #tpu.memory_space<vmem>>, vector<1x8x1xf32>
    %173 = vector.shape_cast %172 : vector<1x8x1xf32> to vector<8x1xf32>
    %174 = vector.shape_cast %171 : vector<8x1xf32> to vector<1x8x1xf32>
    tpu.vector_store %arg9[%c0_56, %c0_57, %c0_58], %174 {strides = array<i32>} : memref<2x8x1xf32, #tpu.memory_space<vmem>>, vector<1x8x1xf32>,
    %c0_59 = arith.constant 0 : index
    %c0_60 = arith.constant 0 : index
    %175 = vector.load %arg4[%c0_59, %c0_60] : memref<32x128xf32, #tpu.memory_space<vmem>>, vector<32x128xf32>
    %c0_61 = arith.constant 0 : index
    %c0_62 = arith.constant 0 : index
    %176 = vector.load %arg6[%c0_61, %c0_62] : memref<1x128xf32, #tpu.memory_space<vmem>>, vector<1x128xf32>
    %c0_63 = arith.constant 0 : index
    %c0_64 = arith.constant 0 : index
    %177 = vector.load %arg11[%c0_63, %c0_64] : memref<64x32xf32, #tpu.memory_space<vmem>>, vector<64x32xf32>
    %cst_65 = arith.constant dense<0.000000e+00> : vector<64x128xf32>
    %178 = tpu.matmul %177, %175, %cst_65 {dimension_numbers = #tpu.dot_dimension_numbers<[1], [0], [0], [1], [0, 0, 1, 1], [], []>} : vector<64x32xf32>, vector<32x128xf32>, vector<64x128xf32> -> vector<64x128xf32>
    %179 = vector.broadcast %176 : vector<1x128xf32> to vector<64x128xf32>
    %180 = arith.addf %178, %179 : vector<64x128xf32>
    %c0_66 = arith.constant 0 : index
    %c0_67 = arith.constant 0 : index
    %181 = vector.load %arg10[%c0_66, %c0_67] : memref<64x128xf32, #tpu.memory_space<vmem>>, vector<64x128xf32>
    tpu.vector_store %arg10[%c0_66, %c0_67], %180 {strides = array<i32>} : memref<64x128xf32, #tpu.memory_space<vmem>>, vector<64x128xf32>,
    %c0_68 = arith.constant 0 : index
    %c0_69 = arith.constant 0 : index
    %182 = vector.load %arg5[%c0_68, %c0_69] : memref<32x128xf32, #tpu.memory_space<vmem>>, vector<32x128xf32>
    %cst_70 = arith.constant 0.000000e+00 : f32
    %183 = vector.broadcast %cst_70 : f32 to vector<8x32xf32>
    %cst_71 = arith.constant 0.000000e+00 : f32
    %184 = vector.broadcast %cst_71 : f32 to vector<8x32xf32>
    %c0_72 = arith.constant 0 : index
    %c0_73 = arith.constant 0 : index
    %185 = vector.load %arg10[%c0_72, %c0_73] : memref<64x128xf32, #tpu.memory_space<vmem>>, vector<8x128xf32>
    %cst_74 = arith.constant dense<0.000000e+00> : vector<8x128xf32>
    %186 = tpu.matmul %183, %182, %cst_74 {dimension_numbers = #tpu.dot_dimension_numbers<[1], [0], [0], [1], [0, 0, 1, 1], [], []>} : vector<8x32xf32>, vector<32x128xf32>, vector<8x128xf32> -> vector<8x128xf32>
    %187 = arith.addf %185, %186 : vector<8x128xf32>
    %188 = arith.negf %187 : vector<8x128xf32>
    %189 = math.exp %188 : vector<8x128xf32>
    %cst_75 = arith.constant 1.000000e+00 : f32
    %190 = vector.broadcast %cst_75 : f32 to vector<8x128xf32>
    %191 = arith.addf %190, %189 : vector<8x128xf32>
    %192 = arith.divf %190, %191 : vector<8x128xf32>
    %193 = math.tanh %187 : vector<8x128xf32>
    %194 = vector.extract_strided_slice %192 {offsets = [0, 0], sizes = [8, 32], strides = [1, 1]} : vector<8x128xf32> to vector<8x32xf32>
    %195 = vector.extract_strided_slice %192 {offsets = [0, 32], sizes = [8, 32], strides = [1, 1]} : vector<8x128xf32> to vector<8x32xf32>
    %196 = vector.extract_strided_slice %193 {offsets = [0, 64], sizes = [8, 32], strides = [1, 1]} : vector<8x128xf32> to vector<8x32xf32>
    %197 = vector.extract_strided_slice %192 {offsets = [0, 96], sizes = [8, 32], strides = [1, 1]} : vector<8x128xf32> to vector<8x32xf32>
    %198 = arith.mulf %195, %184 : vector<8x32xf32>
    %199 = arith.mulf %194, %196 : vector<8x32xf32>
    %200 = arith.addf %198, %199 : vector<8x32xf32>
    %201 = math.tanh %200 : vector<8x32xf32>
    %202 = arith.mulf %197, %201 : vector<8x32xf32>
    %c8_76 = arith.constant 8 : index
    %c0_77 = arith.constant 0 : index
    %203 = vector.load %arg10[%c8_76, %c0_77] : memref<64x128xf32, #tpu.memory_space<vmem>>, vector<8x128xf32>
    %cst_78 = arith.constant dense<0.000000e+00> : vector<8x128xf32>
    %204 = tpu.matmul %202, %182, %cst_78 {dimension_numbers = #tpu.dot_dimension_numbers<[1], [0], [0], [1], [0, 0, 1, 1], [], []>} : vector<8x32xf32>, vector<32x128xf32>, vector<8x128xf32> -> vector<8x128xf32>
    %205 = arith.addf %203, %204 : vector<8x128xf32>
    %206 = arith.negf %205 : vector<8x128xf32>
    %207 = math.exp %206 : vector<8x128xf32>
    %cst_79 = arith.constant 1.000000e+00 : f32
    %208 = vector.broadcast %cst_79 : f32 to vector<8x128xf32>
    %209 = arith.addf %208, %207 : vector<8x128xf32>
    %210 = arith.divf %208, %209 : vector<8x128xf32>
    %211 = math.tanh %205 : vector<8x128xf32>
    %212 = vector.extract_strided_slice %210 {offsets = [0, 0], sizes = [8, 32], strides = [1, 1]} : vector<8x128xf32> to vector<8x32xf32>
    %213 = vector.extract_strided_slice %210 {offsets = [0, 32], sizes = [8, 32], strides = [1, 1]} : vector<8x128xf32> to vector<8x32xf32>
    %214 = vector.extract_strided_slice %211 {offsets = [0, 64], sizes = [8, 32], strides = [1, 1]} : vector<8x128xf32> to vector<8x32xf32>
    %215 = vector.extract_strided_slice %210 {offsets = [0, 96], sizes = [8, 32], strides = [1, 1]} : vector<8x128xf32> to vector<8x32xf32>
    %216 = arith.mulf %213, %200 : vector<8x32xf32>
    %217 = arith.mulf %212, %214 : vector<8x32xf32>
    %218 = arith.addf %216, %217 : vector<8x32xf32>
    %219 = math.tanh %218 : vector<8x32xf32>
    %220 = arith.mulf %215, %219 : vector<8x32xf32>
    %c16_80 = arith.constant 16 : index
    %c0_81 = arith.constant 0 : index
    %221 = vector.load %arg10[%c16_80, %c0_81] : memref<64x128xf32, #tpu.memory_space<vmem>>, vector<8x128xf32>
    %cst_82 = arith.constant dense<0.000000e+00> : vector<8x128xf32>
    %222 = tpu.matmul %220, %182, %cst_82 {dimension_numbers = #tpu.dot_dimension_numbers<[1], [0], [0], [1], [0, 0, 1, 1], [], []>} : vector<8x32xf32>, vector<32x128xf32>, vector<8x128xf32> -> vector<8x128xf32>
    %223 = arith.addf %221, %222 : vector<8x128xf32>
    %224 = arith.negf %223 : vector<8x128xf32>
    %225 = math.exp %224 : vector<8x128xf32>
    %cst_83 = arith.constant 1.000000e+00 : f32
    %226 = vector.broadcast %cst_83 : f32 to vector<8x128xf32>
    %227 = arith.addf %226, %225 : vector<8x128xf32>
    %228 = arith.divf %226, %227 : vector<8x128xf32>
    %229 = math.tanh %223 : vector<8x128xf32>
    %230 = vector.extract_strided_slice %228 {offsets = [0, 0], sizes = [8, 32], strides = [1, 1]} : vector<8x128xf32> to vector<8x32xf32>
    %231 = vector.extract_strided_slice %228 {offsets = [0, 32], sizes = [8, 32], strides = [1, 1]} : vector<8x128xf32> to vector<8x32xf32>
    %232 = vector.extract_strided_slice %229 {offsets = [0, 64], sizes = [8, 32], strides = [1, 1]} : vector<8x128xf32> to vector<8x32xf32>
    %233 = vector.extract_strided_slice %228 {offsets = [0, 96], sizes = [8, 32], strides = [1, 1]} : vector<8x128xf32> to vector<8x32xf32>
    %234 = arith.mulf %231, %218 : vector<8x32xf32>
    %235 = arith.mulf %230, %232 : vector<8x32xf32>
    %236 = arith.addf %234, %235 : vector<8x32xf32>
    %237 = math.tanh %236 : vector<8x32xf32>
    %238 = arith.mulf %233, %237 : vector<8x32xf32>
    %c24_84 = arith.constant 24 : index
    %c0_85 = arith.constant 0 : index
    %239 = vector.load %arg10[%c24_84, %c0_85] : memref<64x128xf32, #tpu.memory_space<vmem>>, vector<8x128xf32>
    %cst_86 = arith.constant dense<0.000000e+00> : vector<8x128xf32>
    %240 = tpu.matmul %238, %182, %cst_86 {dimension_numbers = #tpu.dot_dimension_numbers<[1], [0], [0], [1], [0, 0, 1, 1], [], []>} : vector<8x32xf32>, vector<32x128xf32>, vector<8x128xf32> -> vector<8x128xf32>
    %241 = arith.addf %239, %240 : vector<8x128xf32>
    %242 = arith.negf %241 : vector<8x128xf32>
    %243 = math.exp %242 : vector<8x128xf32>
    %cst_87 = arith.constant 1.000000e+00 : f32
    %244 = vector.broadcast %cst_87 : f32 to vector<8x128xf32>
    %245 = arith.addf %244, %243 : vector<8x128xf32>
    %246 = arith.divf %244, %245 : vector<8x128xf32>
    %247 = math.tanh %241 : vector<8x128xf32>
    %248 = vector.extract_strided_slice %246 {offsets = [0, 0], sizes = [8, 32], strides = [1, 1]} : vector<8x128xf32> to vector<8x32xf32>
    %249 = vector.extract_strided_slice %246 {offsets = [0, 32], sizes = [8, 32], strides = [1, 1]} : vector<8x128xf32> to vector<8x32xf32>
    %250 = vector.extract_strided_slice %247 {offsets = [0, 64], sizes = [8, 32], strides = [1, 1]} : vector<8x128xf32> to vector<8x32xf32>
    %251 = vector.extract_strided_slice %246 {offsets = [0, 96], sizes = [8, 32], strides = [1, 1]} : vector<8x128xf32> to vector<8x32xf32>
    %252 = arith.mulf %249, %236 : vector<8x32xf32>
    %253 = arith.mulf %248, %250 : vector<8x32xf32>
    %254 = arith.addf %252, %253 : vector<8x32xf32>
    %255 = math.tanh %254 : vector<8x32xf32>
    %256 = arith.mulf %251, %255 : vector<8x32xf32>
    %c32_88 = arith.constant 32 : index
    %c0_89 = arith.constant 0 : index
    %257 = vector.load %arg10[%c32_88, %c0_89] : memref<64x128xf32, #tpu.memory_space<vmem>>, vector<8x128xf32>
    %cst_90 = arith.constant dense<0.000000e+00> : vector<8x128xf32>
    %258 = tpu.matmul %256, %182, %cst_90 {dimension_numbers = #tpu.dot_dimension_numbers<[1], [0], [0], [1], [0, 0, 1, 1], [], []>} : vector<8x32xf32>, vector<32x128xf32>, vector<8x128xf32> -> vector<8x128xf32>
    %259 = arith.addf %257, %258 : vector<8x128xf32>
    %260 = arith.negf %259 : vector<8x128xf32>
    %261 = math.exp %260 : vector<8x128xf32>
    %cst_91 = arith.constant 1.000000e+00 : f32
    %262 = vector.broadcast %cst_91 : f32 to vector<8x128xf32>
    %263 = arith.addf %262, %261 : vector<8x128xf32>
    %264 = arith.divf %262, %263 : vector<8x128xf32>
    %265 = math.tanh %259 : vector<8x128xf32>
    %266 = vector.extract_strided_slice %264 {offsets = [0, 0], sizes = [8, 32], strides = [1, 1]} : vector<8x128xf32> to vector<8x32xf32>
    %267 = vector.extract_strided_slice %264 {offsets = [0, 32], sizes = [8, 32], strides = [1, 1]} : vector<8x128xf32> to vector<8x32xf32>
    %268 = vector.extract_strided_slice %265 {offsets = [0, 64], sizes = [8, 32], strides = [1, 1]} : vector<8x128xf32> to vector<8x32xf32>
    %269 = vector.extract_strided_slice %264 {offsets = [0, 96], sizes = [8, 32], strides = [1, 1]} : vector<8x128xf32> to vector<8x32xf32>
    %270 = arith.mulf %267, %254 : vector<8x32xf32>
    %271 = arith.mulf %266, %268 : vector<8x32xf32>
    %272 = arith.addf %270, %271 : vector<8x32xf32>
    %273 = math.tanh %272 : vector<8x32xf32>
    %274 = arith.mulf %269, %273 : vector<8x32xf32>
    %c40_92 = arith.constant 40 : index
    %c0_93 = arith.constant 0 : index
    %275 = vector.load %arg10[%c40_92, %c0_93] : memref<64x128xf32, #tpu.memory_space<vmem>>, vector<8x128xf32>
    %cst_94 = arith.constant dense<0.000000e+00> : vector<8x128xf32>
    %276 = tpu.matmul %274, %182, %cst_94 {dimension_numbers = #tpu.dot_dimension_numbers<[1], [0], [0], [1], [0, 0, 1, 1], [], []>} : vector<8x32xf32>, vector<32x128xf32>, vector<8x128xf32> -> vector<8x128xf32>
    %277 = arith.addf %275, %276 : vector<8x128xf32>
    %278 = arith.negf %277 : vector<8x128xf32>
    %279 = math.exp %278 : vector<8x128xf32>
    %cst_95 = arith.constant 1.000000e+00 : f32
    %280 = vector.broadcast %cst_95 : f32 to vector<8x128xf32>
    %281 = arith.addf %280, %279 : vector<8x128xf32>
    %282 = arith.divf %280, %281 : vector<8x128xf32>
    %283 = math.tanh %277 : vector<8x128xf32>
    %284 = vector.extract_strided_slice %282 {offsets = [0, 0], sizes = [8, 32], strides = [1, 1]} : vector<8x128xf32> to vector<8x32xf32>
    %285 = vector.extract_strided_slice %282 {offsets = [0, 32], sizes = [8, 32], strides = [1, 1]} : vector<8x128xf32> to vector<8x32xf32>
    %286 = vector.extract_strided_slice %283 {offsets = [0, 64], sizes = [8, 32], strides = [1, 1]} : vector<8x128xf32> to vector<8x32xf32>
    %287 = vector.extract_strided_slice %282 {offsets = [0, 96], sizes = [8, 32], strides = [1, 1]} : vector<8x128xf32> to vector<8x32xf32>
    %288 = arith.mulf %285, %272 : vector<8x32xf32>
    %289 = arith.mulf %284, %286 : vector<8x32xf32>
    %290 = arith.addf %288, %289 : vector<8x32xf32>
    %291 = math.tanh %290 : vector<8x32xf32>
    %292 = arith.mulf %287, %291 : vector<8x32xf32>
    %c48_96 = arith.constant 48 : index
    %c0_97 = arith.constant 0 : index
    %293 = vector.load %arg10[%c48_96, %c0_97] : memref<64x128xf32, #tpu.memory_space<vmem>>, vector<8x128xf32>
    %cst_98 = arith.constant dense<0.000000e+00> : vector<8x128xf32>
    %294 = tpu.matmul %292, %182, %cst_98 {dimension_numbers = #tpu.dot_dimension_numbers<[1], [0], [0], [1], [0, 0, 1, 1], [], []>} : vector<8x32xf32>, vector<32x128xf32>, vector<8x128xf32> -> vector<8x128xf32>
    %295 = arith.addf %293, %294 : vector<8x128xf32>
    %296 = arith.negf %295 : vector<8x128xf32>
    %297 = math.exp %296 : vector<8x128xf32>
    %cst_99 = arith.constant 1.000000e+00 : f32
    %298 = vector.broadcast %cst_99 : f32 to vector<8x128xf32>
    %299 = arith.addf %298, %297 : vector<8x128xf32>
    %300 = arith.divf %298, %299 : vector<8x128xf32>
    %301 = math.tanh %295 : vector<8x128xf32>
    %302 = vector.extract_strided_slice %300 {offsets = [0, 0], sizes = [8, 32], strides = [1, 1]} : vector<8x128xf32> to vector<8x32xf32>
    %303 = vector.extract_strided_slice %300 {offsets = [0, 32], sizes = [8, 32], strides = [1, 1]} : vector<8x128xf32> to vector<8x32xf32>
    %304 = vector.extract_strided_slice %301 {offsets = [0, 64], sizes = [8, 32], strides = [1, 1]} : vector<8x128xf32> to vector<8x32xf32>
    %305 = vector.extract_strided_slice %300 {offsets = [0, 96], sizes = [8, 32], strides = [1, 1]} : vector<8x128xf32> to vector<8x32xf32>
    %306 = arith.mulf %303, %290 : vector<8x32xf32>
    %307 = arith.mulf %302, %304 : vector<8x32xf32>
    %308 = arith.addf %306, %307 : vector<8x32xf32>
    %309 = math.tanh %308 : vector<8x32xf32>
    %310 = arith.mulf %305, %309 : vector<8x32xf32>
    %c56_100 = arith.constant 56 : index
    %c0_101 = arith.constant 0 : index
    %311 = vector.load %arg10[%c56_100, %c0_101] : memref<64x128xf32, #tpu.memory_space<vmem>>, vector<8x128xf32>
    %cst_102 = arith.constant dense<0.000000e+00> : vector<8x128xf32>
    %312 = tpu.matmul %310, %182, %cst_102 {dimension_numbers = #tpu.dot_dimension_numbers<[1], [0], [0], [1], [0, 0, 1, 1], [], []>} : vector<8x32xf32>, vector<32x128xf32>, vector<8x128xf32> -> vector<8x128xf32>
    %313 = arith.addf %311, %312 : vector<8x128xf32>
    %314 = arith.negf %313 : vector<8x128xf32>
    %315 = math.exp %314 : vector<8x128xf32>
    %cst_103 = arith.constant 1.000000e+00 : f32
    %316 = vector.broadcast %cst_103 : f32 to vector<8x128xf32>
    %317 = arith.addf %316, %315 : vector<8x128xf32>
    %318 = arith.divf %316, %317 : vector<8x128xf32>
    %319 = math.tanh %313 : vector<8x128xf32>
    %320 = vector.extract_strided_slice %318 {offsets = [0, 0], sizes = [8, 32], strides = [1, 1]} : vector<8x128xf32> to vector<8x32xf32>
    %321 = vector.extract_strided_slice %318 {offsets = [0, 32], sizes = [8, 32], strides = [1, 1]} : vector<8x128xf32> to vector<8x32xf32>
    %322 = vector.extract_strided_slice %319 {offsets = [0, 64], sizes = [8, 32], strides = [1, 1]} : vector<8x128xf32> to vector<8x32xf32>
    %323 = arith.mulf %321, %308 : vector<8x32xf32>
    %324 = arith.mulf %320, %322 : vector<8x32xf32>
    %325 = arith.addf %323, %324 : vector<8x32xf32>
    %326 = vector.broadcast %0 : vector<1x32xf32> to vector<8x32xf32>
    %327 = arith.mulf %325, %326 : vector<8x32xf32>
    %cst_104 = arith.constant dense<0.000000e+00> : vector<8xf32>
    %328 = vector.multi_reduction <add>, %327, %cst_104 [1] : vector<8x32xf32> to vector<8xf32>
    %329 = vector.shape_cast %328 : vector<8xf32> to vector<8x1xf32>
    %330 = vector.broadcast %1 : vector<1x1xf32> to vector<8x1xf32>
    %331 = arith.addf %329, %330 : vector<8x1xf32>
    %c1 = arith.constant 1 : index
    %c0_105 = arith.constant 0 : index
    %c0_106 = arith.constant 0 : index
    %332 = vector.load %arg9[%c1, %c0_105, %c0_106] : memref<2x8x1xf32, #tpu.memory_space<vmem>>, vector<1x8x1xf32>
    %333 = vector.shape_cast %332 : vector<1x8x1xf32> to vector<8x1xf32>
    %334 = vector.shape_cast %331 : vector<8x1xf32> to vector<1x8x1xf32>
    tpu.vector_store %arg9[%c1, %c0_105, %c0_106], %334 {strides = array<i32>} : memref<2x8x1xf32, #tpu.memory_space<vmem>>, vector<1x8x1xf32>,
    return
  }
}

</mosaic_0001>

<bundles_post_ra>
// kernel: lstm_model_forward.1
= control target key start
LH: loop header
LB: loop body
LE: loop exit
PB: predicated region body
PF: predicated region fallthrough
CT: control target
= control target key end

     0   :  { %v2415_v0 = vmov 0.0   ;;  %vm2416_vm0 = vmmov 0   ;;  %v2417_v3 = vmov 0   ;;  %s2418_s22 = smov 64   ;;  %vm127_vm1 = vcmask 261120   ;;  %s2882_s2 = inlined_call_operand.vmem [shape: f32[32,128], index: 2, kind: input, shape index: {}]   ;;  %s2883_s0 = inlined_call_operand.vmem [shape: f32[64,1], index: 0, kind: input, shape index: {}]   ;;  %s2884_s1 = inlined_call_operand.vmem [shape: f32[1,128], index: 1, kind: input, shape index: {}]   ;;  %s2885_s3 = inlined_call_operand.vmem [shape: f32[1,128], index: 3, kind: input, shape index: {}]   ;;  %s2886_s4 = inlined_call_operand.vmem [shape: f32[32,128], index: 4, kind: input, shape index: {}]   ;;  %s2887_s5 = inlined_call_operand.vmem [shape: f32[32,128], index: 5, kind: input, shape index: {}]   ;;  %s2888_s6 = inlined_call_operand.vmem [shape: f32[1,128], index: 6, kind: input, shape index: {}]   ;;  %s2889_s7 = inlined_call_operand.vmem [shape: f32[1,32], index: 7, kind: input, shape index: {}]   ;;  %s2890_s8 = inlined_call_operand.<no memory space> [shape: f32[1,1], index: 8, kind: input, shape index: {}]   ;;  %s2891_s9 = inlined_call_operand.vmem [shape: f32[2,8,1], index: 9, kind: output, shape index: {}]  }
   0x1   :  { %2085 = vmatprep.subr.mxu0 %v2415_v0  ;;  %v2475_v1 = vld [vmem:[%s2882_s2 + $0x18] sm:$0xff]  ;;  %v2480_v2 = vld [vmem:[%s2882_s2 + $0x10] sm:$0xff]  ;;  %2093 = vmatprep.mubr.msk.f32.mxu0 %vm2416_vm0, %v2415_v0  ;;  %v36_v4 = vld [vmem:[%s2883_s0] sm:$0xff]  ;;  %vm975_vm2 = vcmask 7168  }
   0x2   :  { %2086 = vmatpush3.msra.mxu0 %v2475_v1  ;;  %2287 = vset.pattern.permute.xlu0 %v2417_v3  ;;  %v2492_v5 = vld [vmem:[%s2882_s2 + $0x8] sm:$0xff]  ;;  %v2500_v6 = vld [vmem:[%s2882_s2] sm:$0xff]  ;;  %v38_v47 = vld [vmem:[%s2883_s0 + $0x10] sm:$0xff] }
   0x3   :  { %2087 = vmatprep.subr.mxu0 %v2415_v0  ;;  %48 = vperm.xlu0 %2287, %v36_v4   ;;  %v2530_v7 = vld [vmem:[%s2884_s1] ss:$0 sm:$0xff]  ;;  %s2419_s1 = smov 32   ;;  %v37_v26 = vld [vmem:[%s2883_s0 + $0x8] sm:$0xff] }
   0x4   :  { %2088 = vmatpush3.msra.mxu0 %v2480_v2  ;;  %2096 = vmatprep.subr.mxu1 %v2415_v0  ;;  %v2536_v10 = vld [vmem:[%s2885_s3] ss:$0 sm:$0xff] }
   0x5   :  { %2089 = vmatprep.subr.mxu0 %v2415_v0  ;;  %2097 = vmatpush3.msra.mxu1 %v2475_v1 }
   0x6   :  { %2090 = vmatpush3.msra.mxu0 %v2492_v5  ;;  %2098 = vmatprep.subr.mxu1 %v2415_v0 }
   0x7   :  { %2091 = vmatprep.subr.mxu0 %v2415_v0  ;;  %2099 = vmatpush3.msra.mxu1 %v2480_v2 }
   0x8   :  { %2092 = vmatpush3.msra.mxu0 %v2500_v6  ;;  %2100 = vmatprep.subr.mxu1 %v2415_v0 }
   0x9   :  { %2094 = vmatmul.mubr.f32.vlgmr.msra.gmra.mxu0 %v2415_v0  ;;  %2101 = vmatpush3.msra.mxu1 %v2492_v5 }
   0xa   :  { %2102 = vmatprep.subr.mxu1 %v2415_v0  ;;  %2104 = vmatprep.mubr.msk.f32.mxu1 %vm2416_vm0, %v2415_v0 }
   0xb   :  { %2103 = vmatpush3.msra.mxu1 %v2500_v6  ;;  %2288 = vset.pattern.permute.xlu1 %v2417_v3 }
   0xc   :  { %2107 = vmatprep.subr.mxu0 %v2415_v0  ;;  %2115 = vmatprep.mubr.msk.f32.mxu0 %vm2416_vm0, %v2415_v0 }
   0xd   :  { %2108 = vmatpush3.msra.mxu0 %v2475_v1  ;;  %2118 = vmatprep.subr.mxu1 %v2415_v0 }
   0xe   :  { %2109 = vmatprep.subr.mxu0 %v2415_v0 }
   0xf   :  { %2110 = vmatpush3.msra.mxu0 %v2480_v2 }
  0x10   :  { %2111 = vmatprep.subr.mxu0 %v2415_v0 }
  0x11   :  { %2112 = vmatpush3.msra.mxu0 %v2492_v5 }
  0x12   :  { %2113 = vmatprep.subr.mxu0 %v2415_v0 }
  0x13   :  { %2114 = vmatpush3.msra.mxu0 %v2500_v6 }
  0x14   :  { %2129 = vmatprep.subr.mxu0 %v2415_v0 }
  0x7e   :  { %v49_v8 = vpop.permute.xlu0 %48 }
  0x7f   :  { %v92_v9 = vmul.f32 %v2530_v7, %v49_v8 }
  0x81   :  { %v106_v11 = vadd.f32 %v2536_v10, %v92_v9 }
  0xc9   :  { %v197_v12 = vpop.f32.mrf.mxu0 }
  0xca   :  { %v201_v13 = vadd.f32 %v197_v12, %v106_v11  ;;  %v39_v11 = vld [vmem:[%s2883_s0 + $0x18] sm:$0xff] }
  0xcb   :  { %v2095_v14 = vpop.f32.mrf.mxu0 }
  0xcc   :  { %2289 = vtanh.f32 %v201_v13  ;;  %v1951_v16 = vmul.f32 -1.442695, %v201_v13 }
  0xce   :  { %2291 = vpow2.f32 %v1951_v16 }
  0xd9   :  { %v2290_v15 = vpop.eup %2289 }
  0xda   :  { %211 = vrot.lane.b32.xlu0 %v2290_v15, %s2418_s22 }
  0xdb   :  { %v2292_v17 = vpop.eup %2291 }
  0xdc   :  { %v205_v18 = vadd.f32 1.0, %v2292_v17 }
  0xde   :  { %2293 = vrcp.f32 %v205_v18 }
  0xeb   :  { %v2294_v19 = vpop.eup %2293 }
  0xec   :  { %v209_v22 = vmul.f32 0.0, %v2294_v19 }
 0x14c   :  { %v212_v20 = vpop.permute.xlu0 %211 }
 0x14d   :  { %v214_v21 = vmul.f32 %v2294_v19, %v212_v20 }
 0x14f   :  { %216 = vrot.lane.b32.xlu1 %v214_v21, %s2419_s1 }
 0x1c1   :  { %v217_v23 = vpop.permute.xlu1 %216 }
 0x1c2   :  { %v219_v24 = vadd.f32 %v217_v23, %v209_v22 }
 0x1c4   :  { %2295 = vtanh.f32 %v219_v24 }
 0x1d1   :  { %v2296_v25 = vpop.eup %2295 }
 0x1d2   :  { %222 = vrot.lane.b32.xlu1 %v2296_v25, %s2418_s22 }
 0x1d6   :  { %53 = vperm.xlu1 %2288, %v37_v26  }
 0x244   :  { %v223_v27 = vpop.permute.xlu1 %222 }
 0x245   :  { %v225_v28 = vmul.f32 %v2294_v19, %v223_v27 }
 0x247   :  { %227 = vrot.lane.b32.xlu0 %v225_v28, %s2419_s1 }
 0x251   :  { %v54_v30 = vpop.permute.xlu1 %53 }
 0x252   :  { %v93_v31 = vmul.f32 %v2530_v7, %v54_v30 }
 0x254   :  { %v107_v32 = vadd.f32 %v2536_v10, %v93_v31 }
 0x2b9   :  { %v228_v29 = vpop.permute.xlu0 %227 }
 0x2ba   :  { %230 = vst.msk [vmem:[#allocation3] sm:$0xff] %vm127_vm1, %v228_v29  ;;  %2105 = vmatmul.mubr.msk.f32.vlgmr.msra.gmra.mxu1 %vm127_vm1, %v228_v29 }
 0x2bb   :  { %2119 = vmatpush3.msra.mxu1 %v2475_v1  ;;  %2126 = vmatprep.mubr.msk.f32.mxu1 %vm2416_vm0, %v2415_v0 }
 0x2bc   :  { %2120 = vmatprep.subr.mxu1 %v2415_v0 }
 0x2bd   :  { %2121 = vmatpush3.msra.mxu1 %v2480_v2 }
 0x2be   :  { %2122 = vmatprep.subr.mxu1 %v2415_v0 }
 0x2bf   :  { %2123 = vmatpush3.msra.mxu1 %v2492_v5 }
 0x2c0   :  { %2124 = vmatprep.subr.mxu1 %v2415_v0 }
 0x2c1   :  { %2125 = vmatpush3.msra.mxu1 %v2500_v6 }
 0x2c2   :  { %2140 = vmatprep.subr.mxu1 %v2415_v0 }
 0x37a   :  { %v300_v33 = vpop.f32.mrf.mxu1 }
 0x37b   :  { %v304_v34 = vadd.f32 %v300_v33, %v107_v32  ;;  %v40_v32 = vld [vmem:[%s2883_s0 + $0x20] sm:$0xff] }
 0x37c   :  { %v2106_v35 = vpop.f32.mrf.mxu1 }
 0x37d   :  { %2297 = vtanh.f32 %v304_v34  ;;  %v1953_v37 = vmul.f32 -1.442695, %v304_v34 }
 0x37f   :  { %2299 = vpow2.f32 %v1953_v37 }
 0x38a   :  { %v2298_v36 = vpop.eup %2297 }
 0x38b   :  { %314 = vrot.lane.b32.xlu0 %v2298_v36, %s2418_s22 }
 0x38c   :  { %v2300_v38 = vpop.eup %2299 }
 0x38d   :  { %v308_v39 = vadd.f32 1.0, %v2300_v38 }
 0x38f   :  { %2301 = vrcp.f32 %v308_v39 }
 0x39c   :  { %v2302_v40 = vpop.eup %2301 }
 0x39d   :  { %v312_v43 = vmul.f32 %v2302_v40, %v219_v24 }
 0x3fd   :  { %v315_v41 = vpop.permute.xlu0 %314 }
 0x3fe   :  { %v317_v42 = vmul.f32 %v2302_v40, %v315_v41 }
 0x400   :  { %319 = vrot.lane.b32.xlu1 %v317_v42, %s2419_s1 }
 0x472   :  { %v320_v44 = vpop.permute.xlu1 %319 }
 0x473   :  { %v322_v45 = vadd.f32 %v320_v44, %v312_v43 }
 0x475   :  { %2303 = vtanh.f32 %v322_v45 }
 0x482   :  { %v2304_v46 = vpop.eup %2303 }
 0x483   :  { %325 = vrot.lane.b32.xlu0 %v2304_v46, %s2418_s22 }
 0x487   :  { %58 = vperm.xlu0 %2287, %v38_v47  }
 0x4f5   :  { %v326_v48 = vpop.permute.xlu0 %325 }
 0x4f6   :  { %v328_v49 = vmul.f32 %v2302_v40, %v326_v48 }
 0x4f8   :  { %330 = vrot.lane.b32.xlu1 %v328_v49, %s2419_s1 }
 0x502   :  { %v59_v51 = vpop.permute.xlu0 %58 }
 0x503   :  { %v94_v52 = vmul.f32 %v2530_v7, %v59_v51 }
 0x505   :  { %v108_v53 = vadd.f32 %v2536_v10, %v94_v52 }
 0x56a   :  { %v331_v50 = vpop.permute.xlu1 %330 }
 0x56b   :  { %333 = vst.msk [vmem:[#allocation3 + $0x8] sm:$0xff] %vm127_vm1, %v331_v50  ;;  %2116 = vmatmul.mubr.msk.f32.vlgmr.msra.gmra.mxu0 %vm127_vm1, %v331_v50 }
 0x56c   :  { %2130 = vmatpush3.msra.mxu0 %v2475_v1  ;;  %2137 = vmatprep.mubr.msk.f32.mxu0 %vm2416_vm0, %v2415_v0 }
 0x56d   :  { %2131 = vmatprep.subr.mxu0 %v2415_v0 }
 0x56e   :  { %2132 = vmatpush3.msra.mxu0 %v2480_v2 }
 0x56f   :  { %2133 = vmatprep.subr.mxu0 %v2415_v0 }
 0x570   :  { %2134 = vmatpush3.msra.mxu0 %v2492_v5 }
 0x571   :  { %2135 = vmatprep.subr.mxu0 %v2415_v0 }
 0x572   :  { %2136 = vmatpush3.msra.mxu0 %v2500_v6 }
 0x573   :  { %2151 = vmatprep.subr.mxu0 %v2415_v0 }
 0x62b   :  { %v403_v54 = vpop.f32.mrf.mxu0 }
 0x62c   :  { %v407_v55 = vadd.f32 %v403_v54, %v108_v53  ;;  %v41_v53 = vld [vmem:[%s2883_s0 + $0x28] sm:$0xff] }
 0x62d   :  { %v2117_v56 = vpop.f32.mrf.mxu0 }
 0x62e   :  { %2305 = vtanh.f32 %v407_v55  ;;  %v1955_v58 = vmul.f32 -1.442695, %v407_v55 }
 0x630   :  { %2307 = vpow2.f32 %v1955_v58 }
 0x63b   :  { %v2306_v57 = vpop.eup %2305 }
 0x63c   :  { %417 = vrot.lane.b32.xlu1 %v2306_v57, %s2418_s22 }
 0x63d   :  { %v2308_v59 = vpop.eup %2307 }
 0x63e   :  { %v411_v60 = vadd.f32 1.0, %v2308_v59 }
 0x640   :  { %2309 = vrcp.f32 %v411_v60 }
 0x64d   :  { %v2310_v61 = vpop.eup %2309 }
 0x64e   :  { %v415_v3 = vmul.f32 %v2310_v61, %v322_v45 }
 0x6ae   :  { %v418_v62 = vpop.permute.xlu1 %417 }
 0x6af   :  { %v420_v63 = vmul.f32 %v2310_v61, %v418_v62 }
 0x6b1   :  { %422 = vrot.lane.b32.xlu0 %v420_v63, %s2419_s1 }
 0x723   :  { %v423_v4 = vpop.permute.xlu0 %422 }
 0x724   :  { %v425_v8 = vadd.f32 %v423_v4, %v415_v3 }
 0x726   :  { %2311 = vtanh.f32 %v425_v8 }
 0x733   :  { %v2312_v9 = vpop.eup %2311 }
 0x734   :  { %428 = vrot.lane.b32.xlu1 %v2312_v9, %s2418_s22 }
 0x738   :  { %63 = vperm.xlu1 %2288, %v39_v11  }
 0x7a6   :  { %v429_v12 = vpop.permute.xlu1 %428 }
 0x7a7   :  { %v431_v13 = vmul.f32 %v2310_v61, %v429_v12 }
 0x7a9   :  { %433 = vrot.lane.b32.xlu0 %v431_v13, %s2419_s1  ;;  %v42_v13 = vld [vmem:[%s2883_s0 + $0x30] sm:$0xff] }
 0x7b3   :  { %v64_v15 = vpop.permute.xlu1 %63 }
 0x7b4   :  { %v95_v16 = vmul.f32 %v2530_v7, %v64_v15 }
 0x7b6   :  { %v109_v17 = vadd.f32 %v2536_v10, %v95_v16 }
 0x81b   :  { %v434_v14 = vpop.permute.xlu0 %433 }
 0x81c   :  { %436 = vst.msk [vmem:[#allocation3 + $0x10] sm:$0xff] %vm127_vm1, %v434_v14  ;;  %2127 = vmatmul.mubr.msk.f32.vlgmr.msra.gmra.mxu1 %vm127_vm1, %v434_v14  ;;  %v980_v14 = vld [vmem:[%s2886_s4 + $0x18] sm:$0xff] }
 0x81d   :  { %2141 = vmatpush3.msra.mxu1 %v2475_v1  ;;  %2148 = vmatprep.mubr.msk.f32.mxu1 %vm2416_vm0, %v2415_v0 }
 0x81e   :  { %2142 = vmatprep.subr.mxu1 %v2415_v0 }
 0x81f   :  { %2143 = vmatpush3.msra.mxu1 %v2480_v2 }
 0x820   :  { %2144 = vmatprep.subr.mxu1 %v2415_v0 }
 0x821   :  { %2145 = vmatpush3.msra.mxu1 %v2492_v5 }
 0x822   :  { %2146 = vmatprep.subr.mxu1 %v2415_v0 }
 0x823   :  { %2147 = vmatpush3.msra.mxu1 %v2500_v6 }
 0x824   :  { %2162 = vmatprep.subr.mxu1 %v2415_v0 }
 0x8dc   :  { %v506_v18 = vpop.f32.mrf.mxu1 }
 0x8dd   :  { %v510_v19 = vadd.f32 %v506_v18, %v109_v17  ;;  %v979_v18 = vld [vmem:[%s2886_s4 + $0x10] sm:$0xff] }
 0x8de   :  { %v2128_v20 = vpop.f32.mrf.mxu1 }
 0x8df   :  { %2313 = vtanh.f32 %v510_v19  ;;  %v1957_v22 = vmul.f32 -1.442695, %v510_v19  ;;  %v982_v19 = vld [vmem:[#allocation3] sm:$0xff]  ;;  %v978_v20 = vld [vmem:[%s2886_s4 + $0x8] sm:$0xff] }
 0x8e1   :  { %2315 = vpow2.f32 %v1957_v22  ;;  %v983_v22 = vld [vmem:[#allocation3 + $0x8] sm:$0xff] }
 0x8ec   :  { %v2314_v21 = vpop.eup %2313 }
 0x8ed   :  { %520 = vrot.lane.b32.xlu0 %v2314_v21, %s2418_s22  ;;  %v977_v21 = vld [vmem:[%s2886_s4] sm:$0xff] }
 0x8ee   :  { %v2316_v23 = vpop.eup %2315 }
 0x8ef   :  { %v514_v24 = vadd.f32 1.0, %v2316_v23  ;;  %v984_v23 = vld [vmem:[#allocation3 + $0x10] sm:$0xff] }
 0x8f1   :  { %2317 = vrcp.f32 %v514_v24 }
 0x8fe   :  { %v2318_v25 = vpop.eup %2317 }
 0x8ff   :  { %v518_v28 = vmul.f32 %v2318_v25, %v425_v8 }
 0x95f   :  { %v521_v26 = vpop.permute.xlu0 %520 }
 0x960   :  { %v523_v27 = vmul.f32 %v2318_v25, %v521_v26 }
 0x962   :  { %525 = vrot.lane.b32.xlu1 %v523_v27, %s2419_s1 }
 0x9d4   :  { %v526_v29 = vpop.permute.xlu1 %525 }
 0x9d5   :  { %v528_v30 = vadd.f32 %v526_v29, %v518_v28 }
 0x9d7   :  { %2319 = vtanh.f32 %v528_v30 }
 0x9e4   :  { %v2320_v31 = vpop.eup %2319 }
 0x9e5   :  { %531 = vrot.lane.b32.xlu0 %v2320_v31, %s2418_s22 }
 0x9e9   :  { %68 = vperm.xlu0 %2287, %v40_v32  }
 0xa57   :  { %v532_v33 = vpop.permute.xlu0 %531 }
 0xa58   :  { %v534_v34 = vmul.f32 %v2318_v25, %v532_v33 }
 0xa5a   :  { %536 = vrot.lane.b32.xlu1 %v534_v34, %s2419_s1 }
 0xa64   :  { %v69_v36 = vpop.permute.xlu0 %68 }
 0xa65   :  { %v96_v37 = vmul.f32 %v2530_v7, %v69_v36 }
 0xa67   :  { %v110_v38 = vadd.f32 %v2536_v10, %v96_v37 }
 0xacc   :  { %v537_v35 = vpop.permute.xlu1 %536 }
 0xacd   :  { %539 = vst.msk [vmem:[#allocation3 + $0x18] sm:$0xff] %vm127_vm1, %v537_v35  ;;  %2138 = vmatmul.mubr.msk.f32.vlgmr.msra.gmra.mxu0 %vm127_vm1, %v537_v35 }
 0xace   :  { %2152 = vmatpush3.msra.mxu0 %v2475_v1  ;;  %2159 = vmatprep.mubr.msk.f32.mxu0 %vm2416_vm0, %v2415_v0 }
 0xacf   :  { %2153 = vmatprep.subr.mxu0 %v2415_v0 }
 0xad0   :  { %2154 = vmatpush3.msra.mxu0 %v2480_v2 }
 0xad1   :  { %2155 = vmatprep.subr.mxu0 %v2415_v0 }
 0xad2   :  { %2156 = vmatpush3.msra.mxu0 %v2492_v5 }
 0xad3   :  { %2157 = vmatprep.subr.mxu0 %v2415_v0 }
 0xad4   :  { %2158 = vmatpush3.msra.mxu0 %v2500_v6  ;;  %v985_v24 = vld [vmem:[#allocation3 + $0x18] sm:$0xff] }
 0xad5   :  { %2173 = vmatprep.subr.mxu0 %v980_v14 }
 0xb8d   :  { %v609_v39 = vpop.f32.mrf.mxu0 }
 0xb8e   :  { %v613_v40 = vadd.f32 %v609_v39, %v110_v38 }
 0xb8f   :  { %v2139_v41 = vpop.f32.mrf.mxu0 }
 0xb90   :  { %2321 = vtanh.f32 %v613_v40  ;;  %v1959_v43 = vmul.f32 -1.442695, %v613_v40 }
 0xb92   :  { %2323 = vpow2.f32 %v1959_v43 }
 0xb9d   :  { %v2322_v42 = vpop.eup %2321 }
 0xb9e   :  { %623 = vrot.lane.b32.xlu1 %v2322_v42, %s2418_s22 }
 0xb9f   :  { %v2324_v44 = vpop.eup %2323 }
 0xba0   :  { %v617_v45 = vadd.f32 1.0, %v2324_v44  ;;  %v2682_v44 = vld [vmem:[%s2887_s5 + $0x18] sm:$0xff] }
 0xba2   :  { %2325 = vrcp.f32 %v617_v45  ;;  %v2688_v45 = vld [vmem:[%s2887_s5 + $0x10] sm:$0xff] }
 0xbaf   :  { %v2326_v46 = vpop.eup %2325 }
 0xbb0   :  { %v621_v49 = vmul.f32 %v2326_v46, %v528_v30 }
 0xc10   :  { %v624_v47 = vpop.permute.xlu1 %623 }
 0xc11   :  { %v626_v48 = vmul.f32 %v2326_v46, %v624_v47  ;;  %v2702_v47 = vld [vmem:[%s2887_s5] sm:$0xff] }
 0xc13   :  { %628 = vrot.lane.b32.xlu0 %v626_v48, %s2419_s1 }
 0xc85   :  { %v629_v50 = vpop.permute.xlu0 %628 }
 0xc86   :  { %v631_v51 = vadd.f32 %v629_v50, %v621_v49 }
 0xc88   :  { %2327 = vtanh.f32 %v631_v51 }
 0xc95   :  { %v2328_v52 = vpop.eup %2327 }
 0xc96   :  { %634 = vrot.lane.b32.xlu1 %v2328_v52, %s2418_s22 }
 0xc9a   :  { %73 = vperm.xlu1 %2288, %v41_v53  }
 0xd08   :  { %v635_v54 = vpop.permute.xlu1 %634 }
 0xd09   :  { %v637_v55 = vmul.f32 %v2326_v46, %v635_v54  ;;  %v2695_v46 = vld [vmem:[%s2887_s5 + $0x8] sm:$0xff] }
 0xd0b   :  { %639 = vrot.lane.b32.xlu0 %v637_v55, %s2419_s1 }
 0xd15   :  { %v74_v57 = vpop.permute.xlu1 %73 }
 0xd7d   :  { %v640_v56 = vpop.permute.xlu0 %639 }
 0xd7e   :  { %642 = vst.msk [vmem:[#allocation3 + $0x20] sm:$0xff] %vm127_vm1, %v640_v56  ;;  %2149 = vmatmul.mubr.msk.f32.vlgmr.msra.gmra.mxu1 %vm127_vm1, %v640_v56  ;;  %v2737_v56 = vld [vmem:[%s2888_s6] ss:$0 sm:$0xff] }
 0xd7f   :  { %2163 = vmatpush3.msra.mxu1 %v2475_v1  ;;  %2170 = vmatprep.mubr.msk.f32.mxu1 %vm2416_vm0, %v2415_v0  ;;  %v97_v1 = vmul.f32 %v2530_v7, %v74_v57 }
 0xd80   :  { %2164 = vmatprep.subr.mxu1 %v2415_v0 }
 0xd81   :  { %2165 = vmatpush3.msra.mxu1 %v2480_v2  ;;  %v111_v58 = vadd.f32 %v2536_v10, %v97_v1 }
 0xd82   :  { %2166 = vmatprep.subr.mxu1 %v2415_v0 }
 0xd83   :  { %2167 = vmatpush3.msra.mxu1 %v2492_v5 }
 0xd84   :  { %2168 = vmatprep.subr.mxu1 %v2415_v0 }
 0xd85   :  { %2169 = vmatpush3.msra.mxu1 %v2500_v6  ;;  %v986_v25 = vld [vmem:[#allocation3 + $0x20] sm:$0xff] }
 0xd86   :  { %2193 = vmatprep.subr.mxu1 %v2415_v0 }
 0xe3e   :  { %v712_v59 = vpop.f32.mrf.mxu1 }
 0xe3f   :  { %v716_v60 = vadd.f32 %v712_v59, %v111_v58 }
 0xe40   :  { %v2150_v61 = vpop.f32.mrf.mxu1 }
 0xe41   :  { %2329 = vtanh.f32 %v716_v60  ;;  %v1961_v62 = vmul.f32 -1.442695, %v716_v60 }
 0xe43   :  { %2331 = vpow2.f32 %v1961_v62 }
 0xe4e   :  { %v2330_v2 = vpop.eup %2329 }
 0xe4f   :  { %726 = vrot.lane.b32.xlu0 %v2330_v2, %s2418_s22 }
 0xe50   :  { %v2332_v5 = vpop.eup %2331 }
 0xe51   :  { %v720_v63 = vadd.f32 1.0, %v2332_v5 }
 0xe53   :  { %2333 = vrcp.f32 %v720_v63 }
 0xe60   :  { %v2334_v6 = vpop.eup %2333 }
 0xe61   :  { %v724_v8 = vmul.f32 %v2334_v6, %v631_v51 }
 0xec1   :  { %v727_v3 = vpop.permute.xlu0 %726 }
 0xec2   :  { %v729_v4 = vmul.f32 %v2334_v6, %v727_v3 }
 0xec4   :  { %731 = vrot.lane.b32.xlu1 %v729_v4, %s2419_s1 }
 0xf36   :  { %v732_v9 = vpop.permute.xlu1 %731 }
 0xf37   :  { %v734_v11 = vadd.f32 %v732_v9, %v724_v8 }
 0xf39   :  { %2335 = vtanh.f32 %v734_v11 }
 0xf46   :  { %v2336_v12 = vpop.eup %2335 }
 0xf47   :  { %737 = vrot.lane.b32.xlu0 %v2336_v12, %s2418_s22 }
 0xf4b   :  { %78 = vperm.xlu0 %2287, %v42_v13  }
 0xfb9   :  { %v738_v15 = vpop.permute.xlu0 %737 }
 0xfba   :  { %v740_v16 = vmul.f32 %v2334_v6, %v738_v15 }
 0xfbc   :  { %742 = vrot.lane.b32.xlu1 %v740_v16, %s2419_s1 }
 0xfc6   :  { %v79_v27 = vpop.permute.xlu0 %78 }
 0xfc7   :  { %v98_v28 = vmul.f32 %v2530_v7, %v79_v27 }
 0xfc9   :  { %v112_v29 = vadd.f32 %v2536_v10, %v98_v28 }
0x102e   :  { %v743_v17 = vpop.permute.xlu1 %742 }
0x102f   :  { %745 = vst.msk [vmem:[#allocation3 + $0x28] sm:$0xff] %vm127_vm1, %v743_v17  ;;  %2160 = vmatmul.mubr.msk.f32.vlgmr.msra.gmra.mxu0 %vm127_vm1, %v743_v17 }
0x1030   :  { %2174 = vmatpush3.msra.mxu0 %v980_v14  ;;  %2181 = vmatprep.mubr.msk.f32.mxu0 %vm127_vm1, %v982_v19 }
0x1031   :  { %2175 = vmatprep.subr.mxu0 %v979_v18 }
0x1032   :  { %2176 = vmatpush3.msra.mxu0 %v979_v18 }
0x1033   :  { %2177 = vmatprep.subr.mxu0 %v978_v20 }
0x1034   :  { %2178 = vmatpush3.msra.mxu0 %v978_v20 }
0x1035   :  { %2179 = vmatprep.subr.mxu0 %v977_v21 }
0x1036   :  { %2180 = vmatpush3.msra.mxu0 %v977_v21  ;;  %v987_v26 = vld [vmem:[#allocation3 + $0x28] sm:$0xff] }
0x1037   :  { %2182 = vmatmul.mubr.msk.f32.vlgmr.msra.gmra.mxu0 %vm127_vm1, %v983_v22  ;;  %2215 = vmatprep.subr.mxu0 %v2415_v0 }
0x1038   :  { %2184 = vmatprep.mubr.msk.f32.mxu0 %vm127_vm1, %v984_v23  ;;  %2216 = vmatpush3.msra.mxu0 %v2682_v44 }
0x1039   :  { %2217 = vmatprep.subr.mxu0 %v2415_v0 }
0x103a   :  { %2218 = vmatpush3.msra.mxu0 %v2688_v45 }
0x103b   :  { %2185 = vmatmul.mubr.msk.f32.gmra.mxu0 %vm127_vm1, %v985_v24  ;;  %2219 = vmatprep.subr.mxu0 %v2415_v0 }
0x103c   :  { %2187 = vmatprep.mubr.msk.f32.mxu0 %vm127_vm1, %v986_v25  ;;  %2220 = vmatpush3.msra.mxu0 %v2695_v46 }
0x103d   :  { %2221 = vmatprep.subr.mxu0 %v2415_v0 }
0x103e   :  { %2222 = vmatpush3.msra.mxu0 %v2702_v47 }
0x103f   :  { %2188 = vmatmul.mubr.msk.f32.gmra.mxu0 %vm127_vm1, %v987_v26  ;;  %2237 = vmatprep.subr.mxu0 %v2415_v0 }
0x10ef   :  { %v815_v30 = vpop.f32.mrf.mxu0 }
0x10f0   :  { %v819_v31 = vadd.f32 %v815_v30, %v112_v29 }
0x10f1   :  { %v2161_v32 = vpop.f32.mrf.mxu0 }
0x10f2   :  { %2337 = vtanh.f32 %v819_v31  ;;  %v1963_v34 = vmul.f32 -1.442695, %v819_v31 }
0x10f4   :  { %2339 = vpow2.f32 %v1963_v34 }
0x10f7   :  { %v2732_v52 = vpop.f32.mrf.mxu0 }
0x10f8   :  { %v1092_v28 = vadd.f32 %v2732_v52, %v2737_v56 }
0x10f9   :  { %v1086_v55 = vpop.f32.mrf.mxu0 }
0x10fa   :  { %v1087_v57 = vadd.f32 %v2737_v56, %v1086_v55 }
0x10ff   :  { %v2338_v33 = vpop.eup %2337 }
0x1100   :  { %829 = vrot.lane.b32.xlu1 %v2338_v33, %s2418_s22 }
0x1101   :  { %v2340_v35 = vpop.eup %2339 }
0x1102   :  { %v823_v36 = vadd.f32 1.0, %v2340_v35 }
0x1104   :  { %2341 = vrcp.f32 %v823_v36 }
0x1111   :  { %v2342_v37 = vpop.eup %2341 }
0x1112   :  { %v827_v40 = vmul.f32 %v2342_v37, %v734_v11  ;;  %v43_v11 = vld [vmem:[%s2883_s0 + $0x38] sm:$0xff] }
0x1172   :  { %v830_v38 = vpop.permute.xlu1 %829 }
0x1173   :  { %v832_v39 = vmul.f32 %v2342_v37, %v830_v38 }
0x1175   :  { %834 = vrot.lane.b32.xlu0 %v832_v39, %s2419_s1 }
0x11e7   :  { %v835_v41 = vpop.permute.xlu0 %834 }
0x11e8   :  { %v2675_v42 = vadd.f32 %v835_v41, %v827_v40 }
0x11ea   :  { %2343 = vtanh.f32 %v2675_v42 }
0x11f7   :  { %v2344_v43 = vpop.eup %2343 }
0x11f8   :  { %840 = vrot.lane.b32.xlu1 %v2344_v43, %s2418_s22 }
0x126a   :  { %v841_v48 = vpop.permute.xlu1 %840 }
0x126b   :  { %v843_v49 = vmul.f32 %v2342_v37, %v841_v48 }
0x126d   :  { %845 = vrot.lane.b32.xlu0 %v843_v49, %s2419_s1 }
0x12df   :  { %v846_v50 = vpop.permute.xlu0 %845 }
0x12e0   :  { %848 = vst.msk [vmem:[#allocation3 + $0x30] sm:$0xff] %vm127_vm1, %v846_v50  ;;  %2171 = vmatmul.mubr.msk.f32.vlgmr.msra.gmra.mxu1 %vm127_vm1, %v846_v50 }
0x12e1   :  { %2194 = vmatpush3.msra.mxu1 %v2682_v44  ;;  %2201 = vmatprep.mubr.msk.f32.mxu1 %vm2416_vm0, %v2415_v0 }
0x12e2   :  { %2195 = vmatprep.subr.mxu1 %v2415_v0 }
0x12e3   :  { %2196 = vmatpush3.msra.mxu1 %v2688_v45 }
0x12e4   :  { %2197 = vmatprep.subr.mxu1 %v2415_v0 }
0x12e5   :  { %2198 = vmatpush3.msra.mxu1 %v2695_v46 }
0x12e6   :  { %2199 = vmatprep.subr.mxu1 %v2415_v0 }
0x12e7   :  { %2200 = vmatpush3.msra.mxu1 %v2702_v47  ;;  %v988_v51 = vld [vmem:[#allocation3 + $0x30] sm:$0xff] }
0x12e8   :  { %2202 = vmatmul.mubr.f32.vlgmr.msra.gmra.mxu1 %v2415_v0  ;;  %2190 = vmatprep.mubr.msk.f32.mxu0 %vm127_vm1, %v988_v51 }
0x12e9   :  { %2204 = vmatprep.subr.mxu1 %v2415_v0  ;;  %2212 = vmatprep.mubr.msk.f32.mxu1 %vm2416_vm0, %v2415_v0 }
0x12ea   :  { %2205 = vmatpush3.msra.mxu1 %v2682_v44 }
0x12eb   :  { %2206 = vmatprep.subr.mxu1 %v2415_v0 }
0x12ec   :  { %2207 = vmatpush3.msra.mxu1 %v2688_v45 }
0x12ed   :  { %2208 = vmatprep.subr.mxu1 %v2415_v0 }
0x12ee   :  { %2209 = vmatpush3.msra.mxu1 %v2695_v46 }
0x12ef   :  { %2210 = vmatprep.subr.mxu1 %v2415_v0 }
0x12f0   :  { %2211 = vmatpush3.msra.mxu1 %v2702_v47 }
0x12f1   :  { %2226 = vmatprep.subr.mxu1 %v2415_v0 }
0x13a0   :  { %v918_v53 = vpop.f32.mrf.mxu1 }
0x13a2   :  { %v2172_v54 = vpop.f32.mrf.mxu1 }
0x13a3   :  { %v2186_v54 = vpop.f32.mrf.mxu0 }
0x13a5   :  { %v1096_v55 = vpop.f32.mrf.mxu0 }
0x13a8   :  { %v1204_v1 = vpop.f32.mrf.mxu1 }
0x13a9   :  { %v1208_v58 = vadd.f32 %v1204_v1, %v1087_v57  ;;  %v2793_v57 = vpop.f32.mrf.mxu0 }
0x13aa   :  { %v2203_v59 = vpop.f32.mrf.mxu1 }
0x13ab   :  { %2345 = vtanh.f32 %v1208_v58  ;;  %v1977_v61 = vmul.f32 -1.442695, %v1208_v58  ;;  %v2795_v1 = vpop.f32.mrf.mxu0 }
0x13ad   :  { %2347 = vpow2.f32 %v1977_v61 }
0x13b8   :  { %v2346_v60 = vpop.eup %2345 }
0x13b9   :  { %1218 = vrot.lane.b32.xlu1 %v2346_v60, %s2418_s22  ;;  %v1097_v60 = vadd.f32 %v2737_v56, %v1096_v55 }
0x13ba   :  { %v2348_v2 = vpop.eup %2347 }
0x13bb   :  { %v1212_v62 = vadd.f32 1.0, %v2348_v2 }
0x13bd   :  { %2349 = vrcp.f32 %v1212_v62 }
0x13ca   :  { %v2350_v5 = vpop.eup %2349 }
0x13cb   :  { %v1216_v3 = vmul.f32 0.0, %v2350_v5 }
0x142b   :  { %v1219_v63 = vpop.permute.xlu1 %1218 }
0x142c   :  { %v1221_v6 = vmul.f32 %v2350_v5, %v1219_v63 }
0x142e   :  { %1223 = vrot.lane.b32.xlu0 %v1221_v6, %s2419_s1 }
0x14a0   :  { %v1224_v4 = vpop.permute.xlu0 %1223 }
0x14a1   :  { %v2742_v8 = vadd.f32 %v1224_v4, %v1216_v3 }
0x14a3   :  { %2351 = vtanh.f32 %v2742_v8 }
0x14b0   :  { %v2352_v9 = vpop.eup %2351 }
0x14b1   :  { %1229 = vrot.lane.b32.xlu1 %v2352_v9, %s2418_s22 }
0x14b5   :  { %83 = vperm.xlu1 %2288, %v43_v11  }
0x1523   :  { %v1230_v12 = vpop.permute.xlu1 %1229 }
0x1524   :  { %v1232_v13 = vmul.f32 %v2350_v5, %v1230_v12 }
0x1526   :  { %1235 = vrot.lane.b32.xlu0 %v1232_v13, %s2419_s1 }
0x1530   :  { %v84_v14 = vpop.permute.xlu1 %83 }
0x1531   :  { %v99_v15 = vmul.f32 %v2530_v7, %v84_v14 }
0x1533   :  { %v113_v16 = vadd.f32 %v2536_v10, %v99_v15 }
0x1535   :  { %v922_v17 = vadd.f32 %v918_v53, %v113_v16 }
0x1537   :  { %2353 = vtanh.f32 %v922_v17  ;;  %v1965_v19 = vmul.f32 -1.442695, %v922_v17 }
0x1539   :  { %2355 = vpow2.f32 %v1965_v19 }
0x1544   :  { %v2354_v18 = vpop.eup %2353 }
0x1545   :  { %932 = vrot.lane.b32.xlu0 %v2354_v18, %s2418_s22  ;;  %v1102_v18 = vadd.f32 %v2186_v54, %v2737_v56 }
0x1546   :  { %v2356_v7 = vpop.eup %2355 }
0x1547   :  { %v926_v10 = vadd.f32 1.0, %v2356_v7 }
0x1549   :  { %2357 = vrcp.f32 %v926_v10 }
0x1556   :  { %v2358_v21 = vpop.eup %2357 }
0x1557   :  { %v930_v24 = vmul.f32 %v2358_v21, %v2675_v42 }
0x1598   :  { %v1236_v20 = vpop.permute.xlu0 %1235 }
0x1599   :  { %2213 = vmatmul.mubr.msk.f32.vlgmr.msra.gmra.mxu1 %vm127_vm1, %v1236_v20 }
0x159a   :  { %2227 = vmatpush3.msra.mxu1 %v2682_v44  ;;  %2234 = vmatprep.mubr.msk.f32.mxu1 %vm2416_vm0, %v2415_v0 }
0x159b   :  { %2228 = vmatprep.subr.mxu1 %v2415_v0 }
0x159c   :  { %2229 = vmatpush3.msra.mxu1 %v2688_v45 }
0x159d   :  { %2230 = vmatprep.subr.mxu1 %v2415_v0 }
0x159e   :  { %2231 = vmatpush3.msra.mxu1 %v2695_v46 }
0x159f   :  { %2232 = vmatprep.subr.mxu1 %v2415_v0 }
0x15a0   :  { %2233 = vmatpush3.msra.mxu1 %v2702_v47 }
0x15a1   :  { %2248 = vmatprep.subr.mxu1 %v2415_v0 }
0x15b7   :  { %v933_v22 = vpop.permute.xlu0 %932 }
0x15b8   :  { %v935_v23 = vmul.f32 %v2358_v21, %v933_v22 }
0x15ba   :  { %937 = vrot.lane.b32.xlu0 %v935_v23, %s2419_s1 }
0x162c   :  { %v938_v25 = vpop.permute.xlu0 %937 }
0x162d   :  { %v2766_v26 = vadd.f32 %v938_v25, %v930_v24 }
0x162f   :  { %2359 = vtanh.f32 %v2766_v26 }
0x163c   :  { %v2360_v27 = vpop.eup %2359 }
0x163d   :  { %943 = vrot.lane.b32.xlu0 %v2360_v27, %s2418_s22 }
0x1659   :  { %v1305_v29 = vpop.f32.mrf.mxu1 }
0x165a   :  { %v1309_v30 = vadd.f32 %v1305_v29, %v1092_v28 }
0x165b   :  { %v2214_v31 = vpop.f32.mrf.mxu1 }
0x165c   :  { %2361 = vtanh.f32 %v1309_v30  ;;  %v1979_v35 = vmul.f32 -1.442695, %v1309_v30 }
0x165e   :  { %2363 = vpow2.f32 %v1979_v35  ;;  %v1107_v35 = vadd.f32 %v2737_v56, %v2795_v1 }
0x1669   :  { %v2362_v32 = vpop.eup %2361 }
0x166a   :  { %1319 = vrot.lane.b32.xlu1 %v2362_v32, %s2418_s22 }
0x166b   :  { %v2364_v36 = vpop.eup %2363 }
0x166c   :  { %v1313_v37 = vadd.f32 1.0, %v2364_v36 }
0x166e   :  { %2365 = vrcp.f32 %v1313_v37 }
0x167b   :  { %v2366_v38 = vpop.eup %2365 }
0x167c   :  { %v1317_v43 = vmul.f32 %v2366_v38, %v2742_v8 }
0x16af   :  { %v944_v33 = vpop.permute.xlu0 %943 }
0x16b0   :  { %v946_v34 = vmul.f32 %v2358_v21, %v944_v33 }
0x16b2   :  { %948 = vrot.lane.b32.xlu0 %v946_v34, %s2419_s1 }
0x16dc   :  { %v1320_v39 = vpop.permute.xlu1 %1319 }
0x16dd   :  { %v1322_v40 = vmul.f32 %v2366_v38, %v1320_v39 }
0x16df   :  { %1324 = vrot.lane.b32.xlu1 %v1322_v40, %s2419_s1 }
0x1724   :  { %v949_v41 = vpop.permute.xlu0 %948 }
0x1725   :  { %951 = vst.msk [vmem:[#allocation3 + $0x38] sm:$0xff] %vm127_vm1, %v949_v41 }
0x172c   :  { %v989_v42 = vld [vmem:[#allocation3 + $0x38] sm:$0xff] }
0x172d   :  { %2191 = vmatmul.mubr.msk.f32.gmra.mxu0 %vm127_vm1, %v989_v42 }
0x172e   :  { %2223 = vmatprep.mubr.msk.f32.mxu0 %vm2416_vm0, %v2415_v0 }
0x1751   :  { %v1325_v48 = vpop.permute.xlu1 %1324 }
0x1752   :  { %v1327_v49 = vadd.f32 %v1325_v48, %v1317_v43 }
0x1754   :  { %2367 = vtanh.f32 %v1327_v49 }
0x1761   :  { %v2368_v50 = vpop.eup %2367 }
0x1762   :  { %1330 = vrot.lane.b32.xlu1 %v2368_v50, %s2418_s22 }
0x17d4   :  { %v1331_v51 = vpop.permute.xlu1 %1330 }
0x17d5   :  { %v1333_v52 = vmul.f32 %v2366_v38, %v1331_v51 }
0x17d7   :  { %1336 = vrot.lane.b32.xlu1 %v1333_v52, %s2419_s1 }
0x17ed   :  { %v2797_v58 = vpop.f32.mrf.mxu0 }
0x17ef   :  { %v2799_v59 = vpop.f32.mrf.mxu0 }
0x1849   :  { %v1337_v53 = vpop.permute.xlu1 %1336 }
0x184a   :  { %2224 = vmatmul.mubr.msk.f32.vlgmr.msra.gmra.mxu0 %vm127_vm1, %v1337_v53 }
0x184b   :  { %2238 = vmatpush3.msra.mxu0 %v2682_v44  ;;  %2245 = vmatprep.mubr.msk.f32.mxu0 %vm2416_vm0, %v2415_v0 }
0x184c   :  { %2239 = vmatprep.subr.mxu0 %v2415_v0 }
0x184d   :  { %2240 = vmatpush3.msra.mxu0 %v2688_v45 }
0x184e   :  { %2241 = vmatprep.subr.mxu0 %v2415_v0 }
0x184f   :  { %2242 = vmatpush3.msra.mxu0 %v2695_v46 }
0x1850   :  { %2243 = vmatprep.subr.mxu0 %v2415_v0 }
0x1851   :  { %2244 = vmatpush3.msra.mxu0 %v2702_v47 }
0x1852   :  { %2259 = vmatprep.subr.mxu0 %v2415_v0 }
0x190a   :  { %v1406_v61 = vpop.f32.mrf.mxu0 }
0x190b   :  { %v1410_v2 = vadd.f32 %v1406_v61, %v1097_v60  ;;  %v1112_v60 = vadd.f32 %v2793_v57, %v2737_v56 }
0x190c   :  { %v2225_v62 = vpop.f32.mrf.mxu0 }
0x190d   :  { %2369 = vtanh.f32 %v1410_v2  ;;  %v1981_v63 = vmul.f32 -1.442695, %v1410_v2 }
0x190f   :  { %2371 = vpow2.f32 %v1981_v63 }
0x191a   :  { %v2370_v5 = vpop.eup %2369 }
0x191b   :  { %1420 = vrot.lane.b32.xlu0 %v2370_v5, %s2418_s22 }
0x191c   :  { %v2372_v6 = vpop.eup %2371 }
0x191d   :  { %v1414_v3 = vadd.f32 1.0, %v2372_v6 }
0x191f   :  { %2373 = vrcp.f32 %v1414_v3 }
0x192c   :  { %v2374_v4 = vpop.eup %2373 }
0x192d   :  { %v1418_v11 = vmul.f32 %v2374_v4, %v1327_v49 }
0x198d   :  { %v1421_v8 = vpop.permute.xlu0 %1420 }
0x198e   :  { %v1423_v9 = vmul.f32 %v2374_v4, %v1421_v8 }
0x1990   :  { %1425 = vrot.lane.b32.xlu1 %v1423_v9, %s2419_s1 }
0x1a02   :  { %v1426_v12 = vpop.permute.xlu1 %1425 }
0x1a03   :  { %v1428_v13 = vadd.f32 %v1426_v12, %v1418_v11  ;;  %v1117_v12 = vadd.f32 %v2737_v56, %v2799_v59 }
0x1a05   :  { %2375 = vtanh.f32 %v1428_v13 }
0x1a12   :  { %v2376_v14 = vpop.eup %2375 }
0x1a13   :  { %1431 = vrot.lane.b32.xlu0 %v2376_v14, %s2418_s22 }
0x1a85   :  { %v1432_v15 = vpop.permute.xlu0 %1431 }
0x1a86   :  { %v1434_v16 = vmul.f32 %v2374_v4, %v1432_v15 }
0x1a88   :  { %1437 = vrot.lane.b32.xlu1 %v1434_v16, %s2419_s1 }
0x1afa   :  { %v1438_v17 = vpop.permute.xlu1 %1437 }
0x1afb   :  { %2235 = vmatmul.mubr.msk.f32.vlgmr.msra.gmra.mxu1 %vm127_vm1, %v1438_v17 }
0x1afc   :  { %2249 = vmatpush3.msra.mxu1 %v2682_v44  ;;  %2256 = vmatprep.mubr.msk.f32.mxu1 %vm2416_vm0, %v2415_v0 }
0x1afd   :  { %2250 = vmatprep.subr.mxu1 %v2415_v0 }
0x1afe   :  { %2251 = vmatpush3.msra.mxu1 %v2688_v45 }
0x1aff   :  { %2252 = vmatprep.subr.mxu1 %v2415_v0 }
0x1b00   :  { %2253 = vmatpush3.msra.mxu1 %v2695_v46 }
0x1b01   :  { %2254 = vmatprep.subr.mxu1 %v2415_v0 }
0x1b02   :  { %2255 = vmatpush3.msra.mxu1 %v2702_v47 }
0x1b03   :  { %2270 = vmatprep.subr.mxu1 %v2415_v0 }
0x1bbb   :  { %v1507_v19 = vpop.f32.mrf.mxu1 }
0x1bbc   :  { %v1511_v20 = vadd.f32 %v1507_v19, %v1102_v18 }
0x1bbd   :  { %v2236_v7 = vpop.f32.mrf.mxu1 }
0x1bbe   :  { %2377 = vtanh.f32 %v1511_v20  ;;  %v1983_v21 = vmul.f32 -1.442695, %v1511_v20 }
0x1bc0   :  { %2379 = vpow2.f32 %v1983_v21 }
0x1bcb   :  { %v2378_v10 = vpop.eup %2377 }
0x1bcc   :  { %1521 = vrot.lane.b32.xlu0 %v2378_v10, %s2418_s22 }
0x1bcd   :  { %v2380_v22 = vpop.eup %2379 }
0x1bce   :  { %v1515_v23 = vadd.f32 1.0, %v2380_v22 }
0x1bd0   :  { %2381 = vrcp.f32 %v1515_v23 }
0x1bdd   :  { %v2382_v24 = vpop.eup %2381 }
0x1bde   :  { %v1519_v28 = vmul.f32 %v2382_v24, %v1428_v13 }
0x1c3e   :  { %v1522_v25 = vpop.permute.xlu0 %1521 }
0x1c3f   :  { %v1524_v27 = vmul.f32 %v2382_v24, %v1522_v25 }
0x1c41   :  { %1526 = vrot.lane.b32.xlu1 %v1524_v27, %s2419_s1 }
0x1cb3   :  { %v1527_v29 = vpop.permute.xlu1 %1526 }
0x1cb4   :  { %v1529_v30 = vadd.f32 %v1527_v29, %v1519_v28  ;;  %v1122_v28 = vadd.f32 %v2797_v58, %v2737_v56 }
0x1cb6   :  { %2383 = vtanh.f32 %v1529_v30 }
0x1cc3   :  { %v2384_v31 = vpop.eup %2383 }
0x1cc4   :  { %1532 = vrot.lane.b32.xlu0 %v2384_v31, %s2418_s22 }
0x1d36   :  { %v1533_v32 = vpop.permute.xlu0 %1532 }
0x1d37   :  { %v1535_v33 = vmul.f32 %v2382_v24, %v1533_v32 }
0x1d39   :  { %1538 = vrot.lane.b32.xlu1 %v1535_v33, %s2419_s1  ;;  %v1966_v33 = vld [vmem:[%s2889_s7] ss:$0 sm:$0xff] }
0x1dab   :  { %v1539_v34 = vpop.permute.xlu1 %1538 }
0x1dac   :  { %2246 = vmatmul.mubr.msk.f32.vlgmr.msra.gmra.mxu0 %vm127_vm1, %v1539_v34 }
0x1dad   :  { %2260 = vmatpush3.msra.mxu0 %v2682_v44  ;;  %2267 = vmatprep.mubr.msk.f32.mxu0 %vm2416_vm0, %v2415_v0 }
0x1dae   :  { %2261 = vmatprep.subr.mxu0 %v2415_v0 }
0x1daf   :  { %2262 = vmatpush3.msra.mxu0 %v2688_v45 }
0x1db0   :  { %2263 = vmatprep.subr.mxu0 %v2415_v0 }
0x1db1   :  { %2264 = vmatpush3.msra.mxu0 %v2695_v46 }
0x1db2   :  { %2265 = vmatprep.subr.mxu0 %v2415_v0 }
0x1db3   :  { %2266 = vmatpush3.msra.mxu0 %v2702_v47 }
0x1e6c   :  { %v1608_v36 = vpop.f32.mrf.mxu0 }
0x1e6d   :  { %v1612_v37 = vadd.f32 %v1608_v36, %v1107_v35 }
0x1e6e   :  { %v2247_v38 = vpop.f32.mrf.mxu0 }
0x1e6f   :  { %2385 = vtanh.f32 %v1612_v37  ;;  %v1985_v40 = vmul.f32 -1.442695, %v1612_v37 }
0x1e71   :  { %2387 = vpow2.f32 %v1985_v40  ;;  %v14_v40 = vstv %s2890_s8 }
0x1e72   :  { %15 = vst [vmem:[#allocation4] sm:$0x1] %v14_v40 }
0x1e7c   :  { %v2386_v39 = vpop.eup %2385 }
0x1e7d   :  { %1622 = vrot.lane.b32.xlu0 %v2386_v39, %s2418_s22 }
0x1e7e   :  { %v2388_v41 = vpop.eup %2387 }
0x1e7f   :  { %v1616_v42 = vadd.f32 1.0, %v2388_v41 }
0x1e81   :  { %2389 = vrcp.f32 %v1616_v42 }
0x1e8e   :  { %v2390_v43 = vpop.eup %2389 }
0x1e8f   :  { %v1620_v50 = vmul.f32 %v2390_v43, %v1529_v30 }
0x1eef   :  { %v1623_v48 = vpop.permute.xlu0 %1622 }
0x1ef0   :  { %v1625_v49 = vmul.f32 %v2390_v43, %v1623_v48 }
0x1ef2   :  { %1627 = vrot.lane.b32.xlu1 %v1625_v49, %s2419_s1 }
0x1f64   :  { %v1628_v51 = vpop.permute.xlu1 %1627 }
0x1f65   :  { %v1630_v52 = vadd.f32 %v1628_v51, %v1620_v50 }
0x1f67   :  { %2391 = vtanh.f32 %v1630_v52 }
0x1f74   :  { %v2392_v53 = vpop.eup %2391 }
0x1f75   :  { %1633 = vrot.lane.b32.xlu0 %v2392_v53, %s2418_s22 }
0x1fe7   :  { %v1634_v54 = vpop.permute.xlu0 %1633 }
0x1fe8   :  { %v1636_v55 = vmul.f32 %v2390_v43, %v1634_v54 }
0x1fea   :  { %1639 = vrot.lane.b32.xlu1 %v1636_v55, %s2419_s1 }
0x205c   :  { %v1640_v1 = vpop.permute.xlu1 %1639 }
0x205d   :  { %2257 = vmatmul.mubr.msk.f32.vlgmr.msra.gmra.mxu1 %vm127_vm1, %v1640_v1 }
0x205e   :  { %2271 = vmatpush3.msra.mxu1 %v2682_v44  ;;  %2278 = vmatprep.mubr.msk.f32.mxu1 %vm2416_vm0, %v2415_v0 }
0x205f   :  { %2272 = vmatprep.subr.mxu1 %v2415_v0 }
0x2060   :  { %2273 = vmatpush3.msra.mxu1 %v2688_v45 }
0x2061   :  { %2274 = vmatprep.subr.mxu1 %v2415_v0 }
0x2062   :  { %2275 = vmatpush3.msra.mxu1 %v2695_v46 }
0x2063   :  { %2276 = vmatprep.subr.mxu1 %v2415_v0 }
0x2064   :  { %2277 = vmatpush3.msra.mxu1 %v2702_v47 }
0x211d   :  { %v1709_v61 = vpop.f32.mrf.mxu1 }
0x211e   :  { %v1713_v44 = vadd.f32 %v1709_v61, %v1112_v60 }
0x211f   :  { %v2258_v2 = vpop.f32.mrf.mxu1 }
0x2120   :  { %2393 = vtanh.f32 %v1713_v44  ;;  %v1987_v5 = vmul.f32 -1.442695, %v1713_v44 }
0x2122   :  { %2395 = vpow2.f32 %v1987_v5 }
0x212d   :  { %v2394_v62 = vpop.eup %2393 }
0x212e   :  { %1723 = vrot.lane.b32.xlu0 %v2394_v62, %s2418_s22 }
0x212f   :  { %v2396_v45 = vpop.eup %2395 }
0x2130   :  { %v1717_v63 = vadd.f32 1.0, %v2396_v45 }
0x2132   :  { %2397 = vrcp.f32 %v1717_v63 }
0x213f   :  { %v2398_v46 = vpop.eup %2397 }
0x2140   :  { %v1721_v47 = vmul.f32 %v2398_v46, %v1630_v52 }
0x21a0   :  { %v1724_v6 = vpop.permute.xlu0 %1723 }
0x21a1   :  { %v1726_v0 = vmul.f32 %v2398_v46, %v1724_v6 }
0x21a3   :  { %1728 = vrot.lane.b32.xlu1 %v1726_v0, %s2419_s1 }
0x2215   :  { %v1729_v3 = vpop.permute.xlu1 %1728 }
0x2216   :  { %v1731_v57 = vadd.f32 %v1729_v3, %v1721_v47 }
0x2218   :  { %2399 = vtanh.f32 %v1731_v57 }
0x2225   :  { %v2400_v4 = vpop.eup %2399 }
0x2226   :  { %1734 = vrot.lane.b32.xlu0 %v2400_v4, %s2418_s22 }
0x2298   :  { %v1735_v8 = vpop.permute.xlu0 %1734 }
0x2299   :  { %v1737_v9 = vmul.f32 %v2398_v46, %v1735_v8 }
0x229b   :  { %1740 = vrot.lane.b32.xlu1 %v1737_v9, %s2419_s1 }
0x230d   :  { %v1741_v11 = vpop.permute.xlu1 %1740 }
0x230e   :  { %2268 = vmatmul.mubr.msk.f32.vlgmr.msra.gmra.mxu0 %vm127_vm1, %v1741_v11 }
0x23ce   :  { %v1810_v13 = vpop.f32.mrf.mxu0 }
0x23cf   :  { %v1814_v14 = vadd.f32 %v1810_v13, %v1117_v12 }
0x23d0   :  { %v2269_v15 = vpop.f32.mrf.mxu0 }
0x23d1   :  { %2401 = vtanh.f32 %v1814_v14  ;;  %v1989_v17 = vmul.f32 -1.442695, %v1814_v14 }
0x23d3   :  { %2403 = vpow2.f32 %v1989_v17 }
0x23de   :  { %v2402_v16 = vpop.eup %2401 }
0x23df   :  { %1824 = vrot.lane.b32.xlu0 %v2402_v16, %s2418_s22 }
0x23e0   :  { %v2404_v18 = vpop.eup %2403 }
0x23e1   :  { %v1818_v19 = vadd.f32 1.0, %v2404_v18 }
0x23e3   :  { %2405 = vrcp.f32 %v1818_v19 }
0x23f0   :  { %v2406_v20 = vpop.eup %2405 }
0x23f1   :  { %v1822_v21 = vmul.f32 %v2406_v20, %v1731_v57 }
0x2451   :  { %v1825_v7 = vpop.permute.xlu0 %1824 }
0x2452   :  { %v1827_v10 = vmul.f32 %v2406_v20, %v1825_v7 }
0x2454   :  { %1829 = vrot.lane.b32.xlu1 %v1827_v10, %s2419_s1 }
0x24c6   :  { %v1830_v22 = vpop.permute.xlu1 %1829 }
0x24c7   :  { %v1832_v59 = vadd.f32 %v1830_v22, %v1822_v21 }
0x24c9   :  { %2407 = vtanh.f32 %v1832_v59 }
0x24d6   :  { %v2408_v23 = vpop.eup %2407 }
0x24d7   :  { %1835 = vrot.lane.b32.xlu0 %v2408_v23, %s2418_s22 }
0x2549   :  { %v1836_v24 = vpop.permute.xlu0 %1835 }
0x254a   :  { %v1838_v25 = vmul.f32 %v2406_v20, %v1836_v24 }
0x254c   :  { %1841 = vrot.lane.b32.xlu1 %v1838_v25, %s2419_s1 }
0x25be   :  { %v1842_v27 = vpop.permute.xlu1 %1841 }
0x25bf   :  { %2279 = vmatmul.mubr.msk.f32.vlgmr.msra.gmra.mxu1 %vm127_vm1, %v1842_v27 }
0x267f   :  { %v1911_v29 = vpop.f32.mrf.mxu1 }
0x2680   :  { %v1915_v30 = vadd.f32 %v1911_v29, %v1122_v28 }
0x2681   :  { %v2280_v31 = vpop.f32.mrf.mxu1 }
0x2682   :  { %2409 = vtanh.f32 %v1915_v30  ;;  %v1991_v34 = vmul.f32 -1.442695, %v1915_v30 }
0x2684   :  { %2411 = vpow2.f32 %v1991_v34 }
0x268f   :  { %v2410_v32 = vpop.eup %2409 }
0x2690   :  { %1925 = vrot.lane.b32.xlu0 %v2410_v32, %s2418_s22  ;;  %s2420_s22 = smov 96  }
0x2691   :  { %v2412_v35 = vpop.eup %2411 }
0x2692   :  { %v1919_v36 = vadd.f32 1.0, %v2412_v35 }
0x2694   :  { %957 = vrot.lane.b32.xlu0 %v1966_v33, %s2419_s1  ;;  %2413 = vrcp.f32 %v1919_v36 }
0x26a1   :  { %v2414_v37 = vpop.eup %2413 }
0x26a2   :  { %v1923_v41 = vmul.f32 %v2414_v37, %v1832_v59 }
0x2702   :  { %v1926_v56 = vpop.permute.xlu0 %1925 }
0x2703   :  { %v1928_v58 = vmul.f32 %v2414_v37, %v1926_v56 }
0x2705   :  { %1930 = vrot.lane.b32.xlu1 %v1928_v58, %s2419_s1 }
0x2706   :  { %v958_v38 = vpop.permute.xlu0 %957 }
0x2707   :  { %v960_v39 = vmul.f32 %v958_v38, %v2766_v26  ;;  %v1967_v26 = vld [vmem:[#allocation4] ss:$0 sm:$0xff] }
0x2709   :  { %962 = vrot.lane.b32.xlu1 %v960_v39, %s2420_s22 }
0x2777   :  { %v1931_v42 = vpop.permute.xlu1 %1930 }
0x2778   :  { %v1933_v43 = vadd.f32 %v1931_v42, %v1923_v41 }
0x277a   :  { %v1934_v48 = vmul.f32 %v1933_v43, %v958_v38 }
0x277b   :  { %v963_v49 = vpop.permute.xlu1 %962 }
0x277c   :  { %1936 = vrot.lane.b32.xlu0 %v1934_v48, %s2420_s22  ;;  %v965_v50 = vsel %vm127_vm1, %v963_v49, 0.0 }
0x277d   :  { %966 = vadd.xlane.f32.xlu1 %v965_v50 }
0x27ee   :  { %v1937_v51 = vpop.permute.xlu0 %1936 }
0x27ef   :  { %v1939_v52 = vsel %vm127_vm1, %v1937_v51, 0.0 }
0x27f0   :  { %1940 = vadd.xlane.f32.xlu0 %v1939_v52 }
0x2806   :  { %v967_v53 = vpop.xlane.xlu1 %966 }
0x2807   :  { %v974_v54 = vadd.f32 %v1967_v26, %v967_v53 }
0x2809   :  { %976 = vst.msk [vmem:[%s2891_s9] sm:$0xff] %vm975_vm2, %v974_v54 }
0x2879   :  { %v1941_v55 = vpop.xlane.xlu0 %1940 }
0x287a   :  { %v1942_v1 = vadd.f32 %v1967_v26, %v1941_v55 }
0x287c   :  { %1992 = vst.msk [vmem:[%s2891_s9 + $0x8] sm:$0xff] %vm975_vm2, %v1942_v1 }

</bundles_post_ra>
